<compile_context>
chip_gen: v7x
topology: tpu7x:2x2x1
jax: 0.10.0
libtpu: 0.0.40
codegen_flags: <defaults>
</compile_context>

<pallas_src>
import math
import functools

import jax
import jax.numpy as jnp
from jax.experimental import pallas as pl
from jax.experimental.pallas import tpu as pltpu

# ---- Config (small, consistent with the module) ----
VOCAB_SIZE = 64
BLOCK_SIZE = 8       # T
N_EMBD = 32          # D
HEADS = 4
NUM_BLOCKS = 2
EPS = 1e-5           # nn.LayerNorm default
V_PAD = 128          # lane-dense padded vocab width for the lm_head output

D = N_EMBD
DFF = 4 * N_EMBD
ROWS_PER_LAYER = 3 * D + DFF           # wqkv(32) + wo(32) + w1(32) + w2(128) = 224
W_ROWS = NUM_BLOCKS * ROWS_PER_LAYER + D   # + lm_head rows = 480 (multiple of 16)
B_ROWS_PER_LAYER = 8
B_ROWS = 24                             # 2*8 + 1 (lm_b), padded to a tile-friendly 24


# ---------------------------------------------------------------------------
# Fused Pallas kernel: both transformer layers + lm_head in one invocation
# ---------------------------------------------------------------------------
def agpt_fused_kernel(x_ref, w_ref, b_ref, o_ref, *, n_layers, n_heads, batch, seq):
    x = x_ref[...]                              # (N, D) f32, N = B*T
    N, d_model = x.shape
    dh = d_model // n_heads
    dff = 4 * d_model
    rows_per_layer = 3 * d_model + dff
    scale = 1.0 / math.sqrt(dh)

    # Causal mask (True => not allowed to attend), built once per invocation.
    row = jax.lax.broadcasted_iota(jnp.int32, (seq, seq), 0)
    col = jax.lax.broadcasted_iota(jnp.int32, (seq, seq), 1)
    causal = (col > row)[None]                  # (1, T, T)

    def layernorm(v, w, b):                     # f32 throughout (VPU)
        mu = jnp.mean(v, axis=-1, keepdims=True)
        var = jnp.mean((v - mu) ** 2, axis=-1, keepdims=True)
        return (v - mu) * jax.lax.rsqrt(var + EPS) * w + b

    def to_heads(m):                            # (N, D) -> (H*B, T, dh)
        return jnp.concatenate(
            [m[:, hh * dh:(hh + 1) * dh].reshape(batch, seq, dh)
             for hh in range(n_heads)], axis=0)

    for l in range(n_layers):                   # static unroll (2 layers)
        wb = l * rows_per_layer
        bb = l * B_ROWS_PER_LAYER

        ln1w = b_ref[bb + 0:bb + 1, 0:d_model]
        ln1b = b_ref[bb + 1:bb + 2, 0:d_model]
        ln2w = b_ref[bb + 2:bb + 3, 0:d_model]
        ln2b = b_ref[bb + 3:bb + 4, 0:d_model]
        bqkv = b_ref[bb + 4:bb + 5, 0:3 * d_model]
        bo = b_ref[bb + 5:bb + 6, 0:d_model]
        b1 = b_ref[bb + 6:bb + 7, 0:dff]
        b2 = b_ref[bb + 7:bb + 8, 0:d_model]

        wqkv = w_ref[wb:wb + d_model, 0:3 * d_model]                    # (D, 3D) bf16
        wo = w_ref[wb + d_model:wb + 2 * d_model, 0:d_model]            # (D, D)  bf16
        w1 = w_ref[wb + 2 * d_model:wb + 3 * d_model, 0:dff]            # (D, Dff) bf16
        w2 = w_ref[wb + 3 * d_model:wb + 3 * d_model + dff, 0:d_model]  # (Dff, D) bf16

        # ---- pre-LN causal multi-head self-attention (norm_first=True) ----
        h = layernorm(x, ln1w, ln1b)                                    # (N, D) f32
        qkv = jnp.dot(h.astype(jnp.bfloat16), wqkv,
                      preferred_element_type=jnp.float32) + bqkv        # (N, 3D) f32
        q = qkv[:, 0:d_model]
        k = qkv[:, d_model:2 * d_model]
        v = qkv[:, 2 * d_model:3 * d_model]

        qh, kh, vh = to_heads(q), to_heads(k), to_heads(v)              # (H*B, T, dh)
        s = jnp.einsum('bqd,bkd->bqk', qh, kh,
                       preferred_element_type=jnp.float32) * scale      # (H*B, T, T)
        s = jnp.where(causal, -1e30, s)
        s = s - jnp.max(s, axis=-1, keepdims=True)
        p = jnp.exp(s)
        p = p * pl.reciprocal(jnp.sum(p, axis=-1, keepdims=True), approx=True)
        oh = jnp.einsum('bqk,bkd->bqd', p, vh,
                        preferred_element_type=jnp.float32)             # (H*B, T, dh)

        # Recombine heads along the lane dim (head-major == PyTorch concat order)
        attn_in = jnp.concatenate(
            [oh[hh * batch:(hh + 1) * batch].reshape(N, dh)
             for hh in range(n_heads)], axis=1)                         # (N, D)
        x = x + jnp.dot(attn_in.astype(jnp.bfloat16), wo,
                        preferred_element_type=jnp.float32) + bo

        # ---- pre-LN feed-forward (ReLU, dim_feedforward = 4*D) ----
        h2 = layernorm(x, ln2w, ln2b)
        ff = jnp.dot(h2.astype(jnp.bfloat16), w1,
                     preferred_element_type=jnp.float32) + b1
        ff = jnp.maximum(ff, 0.0)
        x = x + jnp.dot(ff.astype(jnp.bfloat16), w2,
                        preferred_element_type=jnp.float32) + b2

    # ---- lm_head: lane-dense (V padded to 128), single unmasked store ----
    lm_base = n_layers * rows_per_layer
    lmw = w_ref[lm_base:lm_base + d_model, :]          # (D, 128) bf16, pad cols are 0
    lmb = b_ref[n_layers * B_ROWS_PER_LAYER:n_layers * B_ROWS_PER_LAYER + 1, :]
    o_ref[...] = jnp.dot(x.astype(jnp.bfloat16), lmw,
                         preferred_element_type=jnp.float32) + lmb


# ---------------------------------------------------------------------------
# One-time parameter packing (hoisted out of the forward): two lane-dense slabs
# ---------------------------------------------------------------------------
def pack_params(params):
    wslab = jnp.zeros((W_ROWS, 128), jnp.float32)
    bslab = jnp.zeros((B_ROWS, 128), jnp.float32)
    for l, p in enumerate(params["layers"]):
        wb = l * ROWS_PER_LAYER
        wslab = wslab.at[wb:wb + D, :3 * D].set(p["wqkv"])
        wslab = wslab.at[wb + D:wb + 2 * D, :D].set(p["wo"])
        wslab = wslab.at[wb + 2 * D:wb + 3 * D, :DFF].set(p["w1"])
        wslab = wslab.at[wb + 3 * D:wb + 3 * D + DFF, :D].set(p["w2"])
        bb = l * B_ROWS_PER_LAYER
        bslab = bslab.at[bb + 0, :D].set(p["ln1w"])
        bslab = bslab.at[bb + 1, :D].set(p["ln1b"])
        bslab = bslab.at[bb + 2, :D].set(p["ln2w"])
        bslab = bslab.at[bb + 3, :D].set(p["ln2b"])
        bslab = bslab.at[bb + 4, :3 * D].set(p["bqkv"])
        bslab = bslab.at[bb + 5, :D].set(p["bo"])
        bslab = bslab.at[bb + 6, :DFF].set(p["b1"])
        bslab = bslab.at[bb + 7, :D].set(p["b2"])
    lm_base = NUM_BLOCKS * ROWS_PER_LAYER
    wslab = wslab.at[lm_base:lm_base + D, :VOCAB_SIZE].set(params["lm_w_t"])
    bslab = bslab.at[NUM_BLOCKS * B_ROWS_PER_LAYER, :VOCAB_SIZE].set(params["lm_b"])
    return {
        "tok_emb": params["tok_emb"],
        "wslab": wslab.astype(jnp.bfloat16),   # bf16 MXU operands, f32 accumulation
        "bslab": bslab,                        # biases / LN params stay f32
    }


# ---------------------------------------------------------------------------
# Wrapper: one pallas_call for the whole forward
# ---------------------------------------------------------------------------
def run_agpt_fused(x2d, wslab, bslab, *, B, T):
    N = x2d.shape[0]
    vmem = pl.BlockSpec(memory_space=pltpu.MemorySpace.VMEM)   # whole array in VMEM
    kernel = functools.partial(agpt_fused_kernel, n_layers=NUM_BLOCKS,
                               n_heads=HEADS, batch=B, seq=T)
    return pl.pallas_call(
        kernel,
        out_shape=jax.ShapeDtypeStruct((N, V_PAD), jnp.float32),
        in_specs=[vmem, vmem, vmem],
        out_specs=vmem,
    )(x2d, wslab, bslab)


def sinusoidal_pe(T, D_):
    pos = jnp.arange(T, dtype=jnp.float32)[:, None]
    div = jnp.exp(jnp.arange(0, D_, 2, dtype=jnp.float32) * (-math.log(10000.0) / D_))
    pe = jnp.zeros((T, D_), jnp.float32)
    pe = pe.at[:, 0::2].set(jnp.sin(pos * div))
    pe = pe.at[:, 1::2].set(jnp.cos(pos * div))
    return pe


def init_params(key):
    Dff, V = 4 * N_EMBD, VOCAB_SIZE
    keys = jax.random.split(key, 4 + NUM_BLOCKS * 4)
    params = {
        "tok_emb": jax.random.uniform(keys[0], (V, D), jnp.float32, -0.1, 0.1),
        "lm_w_t": jax.random.uniform(keys[1], (D, V), jnp.float32, -0.1, 0.1),
        "lm_b": jnp.zeros((V,), jnp.float32),
        "layers": [],
    }
    for i in range(NUM_BLOCKS):
        k = keys[4 + 4 * i: 8 + 4 * i]
        layer = {
            "ln1w": jnp.ones((D,), jnp.float32), "ln1b": jnp.zeros((D,), jnp.float32),
            # stored pre-transposed: (in, out)
            "wqkv": 0.02 * jax.random.normal(k[0], (D, 3 * D), jnp.float32),
            "bqkv": jnp.zeros((3 * D,), jnp.float32),
            "wo": 0.02 * jax.random.normal(k[1], (D, D), jnp.float32),
            "bo": jnp.zeros((D,), jnp.float32),
            "ln2w": jnp.ones((D,), jnp.float32), "ln2b": jnp.zeros((D,), jnp.float32),
            "w1": 0.02 * jax.random.normal(k[2], (D, Dff), jnp.float32),
            "b1": jnp.zeros((Dff,), jnp.float32),
            "w2": 0.02 * jax.random.normal(k[3], (Dff, D), jnp.float32),
            "b2": jnp.zeros((D,), jnp.float32),
        }
        params["layers"].append(layer)
    return params


@jax.jit
def agpt_forward(packed, idx):
    """Forward pass of AGPT (targets=None path -> returns logits only)."""
    B, T = idx.shape
    assert T <= BLOCK_SIZE
    # TODO(synk): embedding gather + positional encoding stay as plain-JAX glue.
    tok = jnp.take(packed["tok_emb"], idx, axis=0) * math.sqrt(N_EMBD)   # (B, T, D)
    x = (tok + sinusoidal_pe(T, N_EMBD)[None]).astype(jnp.float32)
    logits_pad = run_agpt_fused(x.reshape(B * T, N_EMBD),
                                packed["wslab"], packed["bslab"], B=B, T=T)  # (B*T, 128)
    return logits_pad[:, :VOCAB_SIZE].reshape(B, T, VOCAB_SIZE)


# ---------------------------------------------------------------------------
# Pure-JAX reference (same math, f32 HIGHEST precision) for a sanity check
# ---------------------------------------------------------------------------
def agpt_forward_ref(params, idx):
    B, T = idx.shape
    dh = D // HEADS
    hp = jax.lax.Precision.HIGHEST
    x = jnp.take(params["tok_emb"], idx, axis=0) * math.sqrt(D) + sinusoidal_pe(T, D)[None]
    mask = jnp.triu(jnp.ones((T, T), bool), 1)
    for p in params["layers"]:
        mu = x.mean(-1, keepdims=True)
        var = ((x - mu) ** 2).mean(-1, keepdims=True)
        h = (x - mu) * jax.lax.rsqrt(var + EPS) * p["ln1w"] + p["ln1b"]
        qkv = jnp.einsum("btd,de->bte", h, p["wqkv"], precision=hp) + p["bqkv"]
        q, k, v = jnp.split(qkv, 3, axis=-1)
        q = q.reshape(B, T, HEADS, dh).transpose(0, 2, 1, 3)
        k = k.reshape(B, T, HEADS, dh).transpose(0, 2, 1, 3)
        v = v.reshape(B, T, HEADS, dh).transpose(0, 2, 1, 3)
        s = jnp.einsum("bhqd,bhkd->bhqk", q, k, precision=hp) / math.sqrt(dh)
        s = jnp.where(mask, -1e30, s)
        pattn = jax.nn.softmax(s, axis=-1)
        o = jnp.einsum("bhqk,bhkd->bhqd", pattn, v, precision=hp)
        o = o.transpose(0, 2, 1, 3).reshape(B, T, D)
        x = x + jnp.einsum("btd,de->bte", o, p["wo"], precision=hp) + p["bo"]
        mu2 = x.mean(-1, keepdims=True)
        var2 = ((x - mu2) ** 2).mean(-1, keepdims=True)
        h2 = (x - mu2) * jax.lax.rsqrt(var2 + EPS) * p["ln2w"] + p["ln2b"]
        ff = jax.nn.relu(jnp.einsum("btd,df->btf", h2, p["w1"], precision=hp) + p["b1"])
        x = x + jnp.einsum("btf,fd->btd", ff, p["w2"], precision=hp) + p["b2"]
    return jnp.einsum("btd,dv->btv", x, params["lm_w_t"], precision=hp) + params["lm_b"]


if __name__ == "__main__":
    key = jax.random.PRNGKey(0)
    pkey, ikey = jax.random.split(key)
    params = init_params(pkey)

    # One-time packing (hoisted out of the per-call path).
    packed = pack_params(params)
    packed = jax.tree_util.tree_map(jax.block_until_ready, packed)

    B, T = 2, BLOCK_SIZE
    idx = jax.random.randint(ikey, (B, T), 0, VOCAB_SIZE, dtype=jnp.int32)

    logits = jax.block_until_ready(agpt_forward(packed, idx))
    ref = jax.block_until_ready(agpt_forward_ref(params, idx))

    assert logits.shape == (B, T, VOCAB_SIZE)
    assert bool(jnp.all(jnp.isfinite(logits)))
    assert bool(jnp.allclose(logits, ref, rtol=1e-2, atol=1e-2)), "mismatch vs reference"

    print("KERNEL_OK")
</pallas_src>

<mosaic_0001>
module attributes {stable_mosaic.version = 11 : i64} {
  func.func @agpt_fused_kernel(%arg0: memref<16x32xf32, #tpu.memory_space<vmem>>, %arg1: memref<480x128xbf16, #tpu.memory_space<vmem>>, %arg2: memref<24x128xf32, #tpu.memory_space<vmem>>, %arg3: memref<16x128xf32, #tpu.memory_space<vmem>>) attributes {dimension_semantics = [], scalar_prefetch = 0 : i64, scratch_operands = 0 : i64, tpu.core_type = #tpu.core_type<tc>} {
    %c0 = arith.constant 0 : index
    %c0_0 = arith.constant 0 : index
    %0 = vector.load %arg0[%c0, %c0_0] : memref<16x32xf32, #tpu.memory_space<vmem>>, vector<16x32xf32>
    %1 = tpu.iota {dimensions = array<i32: 0>} : vector<8x8xi32>
    %2 = tpu.iota {dimensions = array<i32: 1>} : vector<8x8xi32>
    %3 = arith.cmpi sgt, %2, %1 : vector<8x8xi32>
    %4 = vector.shape_cast %3 : vector<8x8xi1> to vector<1x8x8xi1>
    %c0_1 = arith.constant 0 : index
    %c0_2 = arith.constant 0 : index
    %5 = vector.load %arg2[%c0_1, %c0_2] : memref<24x128xf32, #tpu.memory_space<vmem>>, vector<1x32xf32>
    %c1 = arith.constant 1 : index
    %c0_3 = arith.constant 0 : index
    %6 = vector.load %arg2[%c1, %c0_3] : memref<24x128xf32, #tpu.memory_space<vmem>>, vector<1x32xf32>
    %c2 = arith.constant 2 : index
    %c0_4 = arith.constant 0 : index
    %7 = vector.load %arg2[%c2, %c0_4] : memref<24x128xf32, #tpu.memory_space<vmem>>, vector<1x32xf32>
    %c3 = arith.constant 3 : index
    %c0_5 = arith.constant 0 : index
    %8 = vector.load %arg2[%c3, %c0_5] : memref<24x128xf32, #tpu.memory_space<vmem>>, vector<1x32xf32>
    %c4 = arith.constant 4 : index
    %c0_6 = arith.constant 0 : index
    %9 = vector.load %arg2[%c4, %c0_6] : memref<24x128xf32, #tpu.memory_space<vmem>>, vector<1x96xf32>
    %c5 = arith.constant 5 : index
    %c0_7 = arith.constant 0 : index
    %10 = vector.load %arg2[%c5, %c0_7] : memref<24x128xf32, #tpu.memory_space<vmem>>, vector<1x32xf32>
    %c6 = arith.constant 6 : index
    %c0_8 = arith.constant 0 : index
    %11 = vector.load %arg2[%c6, %c0_8] : memref<24x128xf32, #tpu.memory_space<vmem>>, vector<1x128xf32>
    %c7 = arith.constant 7 : index
    %c0_9 = arith.constant 0 : index
    %12 = vector.load %arg2[%c7, %c0_9] : memref<24x128xf32, #tpu.memory_space<vmem>>, vector<1x32xf32>
    %c0_10 = arith.constant 0 : index
    %c0_11 = arith.constant 0 : index
    %13 = vector.load %arg1[%c0_10, %c0_11] : memref<480x128xbf16, #tpu.memory_space<vmem>>, vector<32x96xbf16>
    %c32 = arith.constant 32 : index
    %c0_12 = arith.constant 0 : index
    %14 = vector.load %arg1[%c32, %c0_12] : memref<480x128xbf16, #tpu.memory_space<vmem>>, vector<32x32xbf16>
    %c64 = arith.constant 64 : index
    %c0_13 = arith.constant 0 : index
    %15 = vector.load %arg1[%c64, %c0_13] : memref<480x128xbf16, #tpu.memory_space<vmem>>, vector<32x128xbf16>
    %c96 = arith.constant 96 : index
    %c0_14 = arith.constant 0 : index
    %16 = vector.load %arg1[%c96, %c0_14] : memref<480x128xbf16, #tpu.memory_space<vmem>>, vector<128x32xbf16>
    %cst = arith.constant dense<0.000000e+00> : vector<16xf32>
    %17 = vector.multi_reduction <add>, %0, %cst [1] : vector<16x32xf32> to vector<16xf32>
    %18 = vector.shape_cast %17 : vector<16xf32> to vector<16x1xf32>
    %cst_15 = arith.constant 3.200000e+01 : f32
    %19 = vector.broadcast %cst_15 : f32 to vector<16x1xf32>
    %20 = arith.divf %18, %19 : vector<16x1xf32>
    %21 = vector.broadcast %20 : vector<16x1xf32> to vector<16x32xf32>
    %22 = arith.subf %0, %21 : vector<16x32xf32>
    %23 = arith.mulf %22, %22 : vector<16x32xf32>
    %cst_16 = arith.constant dense<0.000000e+00> : vector<16xf32>
    %24 = vector.multi_reduction <add>, %23, %cst_16 [1] : vector<16x32xf32> to vector<16xf32>
    %25 = vector.shape_cast %24 : vector<16xf32> to vector<16x1xf32>
    %cst_17 = arith.constant 3.200000e+01 : f32
    %26 = vector.broadcast %cst_17 : f32 to vector<16x1xf32>
    %27 = arith.divf %25, %26 : vector<16x1xf32>
    %28 = vector.broadcast %20 : vector<16x1xf32> to vector<16x32xf32>
    %29 = arith.subf %0, %28 : vector<16x32xf32>
    %cst_18 = arith.constant 9.99999974E-6 : f32
    %30 = vector.broadcast %cst_18 : f32 to vector<16x1xf32>
    %31 = arith.addf %27, %30 : vector<16x1xf32>
    %32 = math.rsqrt %31 : vector<16x1xf32>
    %33 = vector.broadcast %32 : vector<16x1xf32> to vector<16x32xf32>
    %34 = arith.mulf %29, %33 : vector<16x32xf32>
    %35 = vector.broadcast %5 : vector<1x32xf32> to vector<16x32xf32>
    %36 = arith.mulf %34, %35 : vector<16x32xf32>
    %37 = vector.broadcast %6 : vector<1x32xf32> to vector<16x32xf32>
    %38 = arith.addf %36, %37 : vector<16x32xf32>
    %39 = arith.truncf %38 : vector<16x32xf32> to vector<16x32xbf16>
    %cst_19 = arith.constant dense<0.000000e+00> : vector<16x96xf32>
    %40 = tpu.matmul %39, %13, %cst_19 {dimension_numbers = #tpu.dot_dimension_numbers<[1], [0], [0], [1], [0, 0, 1, 1], [], []>} : vector<16x32xbf16>, vector<32x96xbf16>, vector<16x96xf32> -> vector<16x96xf32>
    %41 = vector.broadcast %9 : vector<1x96xf32> to vector<16x96xf32>
    %42 = arith.addf %40, %41 : vector<16x96xf32>
    %43 = vector.extract_strided_slice %42 {offsets = [0, 0], sizes = [16, 32], strides = [1, 1]} : vector<16x96xf32> to vector<16x32xf32>
    %44 = vector.extract_strided_slice %42 {offsets = [0, 32], sizes = [16, 32], strides = [1, 1]} : vector<16x96xf32> to vector<16x32xf32>
    %45 = vector.extract_strided_slice %42 {offsets = [0, 64], sizes = [16, 32], strides = [1, 1]} : vector<16x96xf32> to vector<16x32xf32>
    %46 = vector.extract_strided_slice %43 {offsets = [0, 0], sizes = [16, 8], strides = [1, 1]} : vector<16x32xf32> to vector<16x8xf32>
    %47 = vector.shape_cast %46 : vector<16x8xf32> to vector<2x8x8xf32>
    %48 = vector.extract_strided_slice %43 {offsets = [0, 8], sizes = [16, 8], strides = [1, 1]} : vector<16x32xf32> to vector<16x8xf32>
    %49 = vector.shape_cast %48 : vector<16x8xf32> to vector<2x8x8xf32>
    %50 = vector.extract_strided_slice %43 {offsets = [0, 16], sizes = [16, 8], strides = [1, 1]} : vector<16x32xf32> to vector<16x8xf32>
    %51 = vector.shape_cast %50 : vector<16x8xf32> to vector<2x8x8xf32>
    %52 = vector.extract_strided_slice %43 {offsets = [0, 24], sizes = [16, 8], strides = [1, 1]} : vector<16x32xf32> to vector<16x8xf32>
    %53 = vector.shape_cast %52 : vector<16x8xf32> to vector<2x8x8xf32>
    %54 = tpu.concatenate %47, %49, %51, %53 in 0 : vector<2x8x8xf32>, vector<2x8x8xf32>, vector<2x8x8xf32>, vector<2x8x8xf32> -> vector<8x8x8xf32>
    %55 = vector.extract_strided_slice %44 {offsets = [0, 0], sizes = [16, 8], strides = [1, 1]} : vector<16x32xf32> to vector<16x8xf32>
    %56 = vector.shape_cast %55 : vector<16x8xf32> to vector<2x8x8xf32>
    %57 = vector.extract_strided_slice %44 {offsets = [0, 8], sizes = [16, 8], strides = [1, 1]} : vector<16x32xf32> to vector<16x8xf32>
    %58 = vector.shape_cast %57 : vector<16x8xf32> to vector<2x8x8xf32>
    %59 = vector.extract_strided_slice %44 {offsets = [0, 16], sizes = [16, 8], strides = [1, 1]} : vector<16x32xf32> to vector<16x8xf32>
    %60 = vector.shape_cast %59 : vector<16x8xf32> to vector<2x8x8xf32>
    %61 = vector.extract_strided_slice %44 {offsets = [0, 24], sizes = [16, 8], strides = [1, 1]} : vector<16x32xf32> to vector<16x8xf32>
    %62 = vector.shape_cast %61 : vector<16x8xf32> to vector<2x8x8xf32>
    %63 = tpu.concatenate %56, %58, %60, %62 in 0 : vector<2x8x8xf32>, vector<2x8x8xf32>, vector<2x8x8xf32>, vector<2x8x8xf32> -> vector<8x8x8xf32>
    %64 = vector.extract_strided_slice %45 {offsets = [0, 0], sizes = [16, 8], strides = [1, 1]} : vector<16x32xf32> to vector<16x8xf32>
    %65 = vector.shape_cast %64 : vector<16x8xf32> to vector<2x8x8xf32>
    %66 = vector.extract_strided_slice %45 {offsets = [0, 8], sizes = [16, 8], strides = [1, 1]} : vector<16x32xf32> to vector<16x8xf32>
    %67 = vector.shape_cast %66 : vector<16x8xf32> to vector<2x8x8xf32>
    %68 = vector.extract_strided_slice %45 {offsets = [0, 16], sizes = [16, 8], strides = [1, 1]} : vector<16x32xf32> to vector<16x8xf32>
    %69 = vector.shape_cast %68 : vector<16x8xf32> to vector<2x8x8xf32>
    %70 = vector.extract_strided_slice %45 {offsets = [0, 24], sizes = [16, 8], strides = [1, 1]} : vector<16x32xf32> to vector<16x8xf32>
    %71 = vector.shape_cast %70 : vector<16x8xf32> to vector<2x8x8xf32>
    %72 = tpu.concatenate %65, %67, %69, %71 in 0 : vector<2x8x8xf32>, vector<2x8x8xf32>, vector<2x8x8xf32>, vector<2x8x8xf32> -> vector<8x8x8xf32>
    "tpu.trace_start"() <{level = 10 : i32, message = "bqd,bkd->bqk"}> : () -> ()
    %cst_20 = arith.constant dense<0.000000e+00> : vector<8x8x8xf32>
    %73 = tpu.matmul %54, %63, %cst_20 {dimension_numbers = #tpu.dot_dimension_numbers<[2], [2], [1], [1], [0, 0, 0, 1, 1, 1], [0], [0]>} : vector<8x8x8xf32>, vector<8x8x8xf32>, vector<8x8x8xf32> -> vector<8x8x8xf32>
    "tpu.trace_stop"() : () -> ()
    %cst_21 = arith.constant 0.353553385 : f32
    %74 = vector.broadcast %cst_21 : f32 to vector<8x8x8xf32>
    %75 = arith.mulf %73, %74 : vector<8x8x8xf32>
    %cst_22 = arith.constant -1.000000e+30 : f32
    %76 = vector.shape_cast %4 : vector<1x8x8xi1> to vector<1x8x8xi1>
    %77 = vector.broadcast %76 : vector<1x8x8xi1> to vector<8x8x8xi1>
    %78 = vector.broadcast %cst_22 : f32 to vector<8x8x8xf32>
    %79 = arith.select %77, %78, %75 : vector<8x8x8xi1>, vector<8x8x8xf32>
    %cst_23 = arith.constant dense<0xFF800000> : vector<8x8xf32>
    %80 = vector.multi_reduction <maximumf>, %79, %cst_23 [2] : vector<8x8x8xf32> to vector<8x8xf32>
    %81 = vector.shape_cast %80 : vector<8x8xf32> to vector<8x8x1xf32>
    %82 = vector.broadcast %81 : vector<8x8x1xf32> to vector<8x8x8xf32>
    %83 = arith.subf %79, %82 : vector<8x8x8xf32>
    %84 = math.exp %83 : vector<8x8x8xf32>
    %cst_24 = arith.constant dense<0.000000e+00> : vector<8x8xf32>
    %85 = vector.multi_reduction <add>, %84, %cst_24 [2] : vector<8x8x8xf32> to vector<8x8xf32>
    %86 = vector.shape_cast %85 : vector<8x8xf32> to vector<8x8x1xf32>
    %87 = tpu.reciprocal %86 {approx = true} : vector<8x8x1xf32> -> vector<8x8x1xf32>
    %88 = vector.broadcast %87 : vector<8x8x1xf32> to vector<8x8x8xf32>
    %89 = arith.mulf %84, %88 : vector<8x8x8xf32>
    "tpu.trace_start"() <{level = 10 : i32, message = "bqk,bkd->bqd"}> : () -> ()
    %cst_25 = arith.constant dense<0.000000e+00> : vector<8x8x8xf32>
    %90 = tpu.matmul %89, %72, %cst_25 {dimension_numbers = #tpu.dot_dimension_numbers<[2], [1], [1], [2], [0, 0, 0, 1, 1, 2], [0], [0]>} : vector<8x8x8xf32>, vector<8x8x8xf32>, vector<8x8x8xf32> -> vector<8x8x8xf32>
    "tpu.trace_stop"() : () -> ()
    %91 = vector.extract_strided_slice %90 {offsets = [0, 0, 0], sizes = [2, 8, 8], strides = [1, 1, 1]} : vector<8x8x8xf32> to vector<2x8x8xf32>
    %92 = vector.shape_cast %91 : vector<2x8x8xf32> to vector<16x8xf32>
    %93 = vector.extract_strided_slice %90 {offsets = [2, 0, 0], sizes = [2, 8, 8], strides = [1, 1, 1]} : vector<8x8x8xf32> to vector<2x8x8xf32>
    %94 = vector.shape_cast %93 : vector<2x8x8xf32> to vector<16x8xf32>
    %95 = vector.extract_strided_slice %90 {offsets = [4, 0, 0], sizes = [2, 8, 8], strides = [1, 1, 1]} : vector<8x8x8xf32> to vector<2x8x8xf32>
    %96 = vector.shape_cast %95 : vector<2x8x8xf32> to vector<16x8xf32>
    %97 = vector.extract_strided_slice %90 {offsets = [6, 0, 0], sizes = [2, 8, 8], strides = [1, 1, 1]} : vector<8x8x8xf32> to vector<2x8x8xf32>
    %98 = vector.shape_cast %97 : vector<2x8x8xf32> to vector<16x8xf32>
    %99 = tpu.concatenate %92, %94, %96, %98 in 1 : vector<16x8xf32>, vector<16x8xf32>, vector<16x8xf32>, vector<16x8xf32> -> vector<16x32xf32>
    %100 = arith.truncf %99 : vector<16x32xf32> to vector<16x32xbf16>
    %cst_26 = arith.constant dense<0.000000e+00> : vector<16x32xf32>
    %101 = tpu.matmul %100, %14, %cst_26 {dimension_numbers = #tpu.dot_dimension_numbers<[1], [0], [0], [1], [0, 0, 1, 1], [], []>} : vector<16x32xbf16>, vector<32x32xbf16>, vector<16x32xf32> -> vector<16x32xf32>
    %102 = arith.addf %0, %101 : vector<16x32xf32>
    %103 = vector.broadcast %10 : vector<1x32xf32> to vector<16x32xf32>
    %104 = arith.addf %102, %103 : vector<16x32xf32>
    %cst_27 = arith.constant dense<0.000000e+00> : vector<16xf32>
    %105 = vector.multi_reduction <add>, %104, %cst_27 [1] : vector<16x32xf32> to vector<16xf32>
    %106 = vector.shape_cast %105 : vector<16xf32> to vector<16x1xf32>
    %cst_28 = arith.constant 3.200000e+01 : f32
    %107 = vector.broadcast %cst_28 : f32 to vector<16x1xf32>
    %108 = arith.divf %106, %107 : vector<16x1xf32>
    %109 = vector.broadcast %108 : vector<16x1xf32> to vector<16x32xf32>
    %110 = arith.subf %104, %109 : vector<16x32xf32>
    %111 = arith.mulf %110, %110 : vector<16x32xf32>
    %cst_29 = arith.constant dense<0.000000e+00> : vector<16xf32>
    %112 = vector.multi_reduction <add>, %111, %cst_29 [1] : vector<16x32xf32> to vector<16xf32>
    %113 = vector.shape_cast %112 : vector<16xf32> to vector<16x1xf32>
    %cst_30 = arith.constant 3.200000e+01 : f32
    %114 = vector.broadcast %cst_30 : f32 to vector<16x1xf32>
    %115 = arith.divf %113, %114 : vector<16x1xf32>
    %116 = vector.broadcast %108 : vector<16x1xf32> to vector<16x32xf32>
    %117 = arith.subf %104, %116 : vector<16x32xf32>
    %cst_31 = arith.constant 9.99999974E-6 : f32
    %118 = vector.broadcast %cst_31 : f32 to vector<16x1xf32>
    %119 = arith.addf %115, %118 : vector<16x1xf32>
    %120 = math.rsqrt %119 : vector<16x1xf32>
    %121 = vector.broadcast %120 : vector<16x1xf32> to vector<16x32xf32>
    %122 = arith.mulf %117, %121 : vector<16x32xf32>
    %123 = vector.broadcast %7 : vector<1x32xf32> to vector<16x32xf32>
    %124 = arith.mulf %122, %123 : vector<16x32xf32>
    %125 = vector.broadcast %8 : vector<1x32xf32> to vector<16x32xf32>
    %126 = arith.addf %124, %125 : vector<16x32xf32>
    %127 = arith.truncf %126 : vector<16x32xf32> to vector<16x32xbf16>
    %cst_32 = arith.constant dense<0.000000e+00> : vector<16x128xf32>
    %128 = tpu.matmul %127, %15, %cst_32 {dimension_numbers = #tpu.dot_dimension_numbers<[1], [0], [0], [1], [0, 0, 1, 1], [], []>} : vector<16x32xbf16>, vector<32x128xbf16>, vector<16x128xf32> -> vector<16x128xf32>
    %129 = vector.broadcast %11 : vector<1x128xf32> to vector<16x128xf32>
    %130 = arith.addf %128, %129 : vector<16x128xf32>
    %cst_33 = arith.constant 0.000000e+00 : f32
    %131 = vector.broadcast %cst_33 : f32 to vector<16x128xf32>
    %132 = arith.maximumf %130, %131 : vector<16x128xf32>
    %133 = arith.truncf %132 : vector<16x128xf32> to vector<16x128xbf16>
    %cst_34 = arith.constant dense<0.000000e+00> : vector<16x32xf32>
    %134 = tpu.matmul %133, %16, %cst_34 {dimension_numbers = #tpu.dot_dimension_numbers<[1], [0], [0], [1], [0, 0, 1, 1], [], []>} : vector<16x128xbf16>, vector<128x32xbf16>, vector<16x32xf32> -> vector<16x32xf32>
    %135 = arith.addf %104, %134 : vector<16x32xf32>
    %136 = vector.broadcast %12 : vector<1x32xf32> to vector<16x32xf32>
    %137 = arith.addf %135, %136 : vector<16x32xf32>
    %c8 = arith.constant 8 : index
    %c0_35 = arith.constant 0 : index
    %138 = vector.load %arg2[%c8, %c0_35] : memref<24x128xf32, #tpu.memory_space<vmem>>, vector<1x32xf32>
    %c9 = arith.constant 9 : index
    %c0_36 = arith.constant 0 : index
    %139 = vector.load %arg2[%c9, %c0_36] : memref<24x128xf32, #tpu.memory_space<vmem>>, vector<1x32xf32>
    %c10 = arith.constant 10 : index
    %c0_37 = arith.constant 0 : index
    %140 = vector.load %arg2[%c10, %c0_37] : memref<24x128xf32, #tpu.memory_space<vmem>>, vector<1x32xf32>
    %c11 = arith.constant 11 : index
    %c0_38 = arith.constant 0 : index
    %141 = vector.load %arg2[%c11, %c0_38] : memref<24x128xf32, #tpu.memory_space<vmem>>, vector<1x32xf32>
    %c12 = arith.constant 12 : index
    %c0_39 = arith.constant 0 : index
    %142 = vector.load %arg2[%c12, %c0_39] : memref<24x128xf32, #tpu.memory_space<vmem>>, vector<1x96xf32>
    %c13 = arith.constant 13 : index
    %c0_40 = arith.constant 0 : index
    %143 = vector.load %arg2[%c13, %c0_40] : memref<24x128xf32, #tpu.memory_space<vmem>>, vector<1x32xf32>
    %c14 = arith.constant 14 : index
    %c0_41 = arith.constant 0 : index
    %144 = vector.load %arg2[%c14, %c0_41] : memref<24x128xf32, #tpu.memory_space<vmem>>, vector<1x128xf32>
    %c15 = arith.constant 15 : index
    %c0_42 = arith.constant 0 : index
    %145 = vector.load %arg2[%c15, %c0_42] : memref<24x128xf32, #tpu.memory_space<vmem>>, vector<1x32xf32>
    %c224 = arith.constant 224 : index
    %c0_43 = arith.constant 0 : index
    %146 = vector.load %arg1[%c224, %c0_43] : memref<480x128xbf16, #tpu.memory_space<vmem>>, vector<32x96xbf16>
    %c256 = arith.constant 256 : index
    %c0_44 = arith.constant 0 : index
    %147 = vector.load %arg1[%c256, %c0_44] : memref<480x128xbf16, #tpu.memory_space<vmem>>, vector<32x32xbf16>
    %c288 = arith.constant 288 : index
    %c0_45 = arith.constant 0 : index
    %148 = vector.load %arg1[%c288, %c0_45] : memref<480x128xbf16, #tpu.memory_space<vmem>>, vector<32x128xbf16>
    %c320 = arith.constant 320 : index
    %c0_46 = arith.constant 0 : index
    %149 = vector.load %arg1[%c320, %c0_46] : memref<480x128xbf16, #tpu.memory_space<vmem>>, vector<128x32xbf16>
    %cst_47 = arith.constant dense<0.000000e+00> : vector<16xf32>
    %150 = vector.multi_reduction <add>, %137, %cst_47 [1] : vector<16x32xf32> to vector<16xf32>
    %151 = vector.shape_cast %150 : vector<16xf32> to vector<16x1xf32>
    %cst_48 = arith.constant 3.200000e+01 : f32
    %152 = vector.broadcast %cst_48 : f32 to vector<16x1xf32>
    %153 = arith.divf %151, %152 : vector<16x1xf32>
    %154 = vector.broadcast %153 : vector<16x1xf32> to vector<16x32xf32>
    %155 = arith.subf %137, %154 : vector<16x32xf32>
    %156 = arith.mulf %155, %155 : vector<16x32xf32>
    %cst_49 = arith.constant dense<0.000000e+00> : vector<16xf32>
    %157 = vector.multi_reduction <add>, %156, %cst_49 [1] : vector<16x32xf32> to vector<16xf32>
    %158 = vector.shape_cast %157 : vector<16xf32> to vector<16x1xf32>
    %cst_50 = arith.constant 3.200000e+01 : f32
    %159 = vector.broadcast %cst_50 : f32 to vector<16x1xf32>
    %160 = arith.divf %158, %159 : vector<16x1xf32>
    %161 = vector.broadcast %153 : vector<16x1xf32> to vector<16x32xf32>
    %162 = arith.subf %137, %161 : vector<16x32xf32>
    %cst_51 = arith.constant 9.99999974E-6 : f32
    %163 = vector.broadcast %cst_51 : f32 to vector<16x1xf32>
    %164 = arith.addf %160, %163 : vector<16x1xf32>
    %165 = math.rsqrt %164 : vector<16x1xf32>
    %166 = vector.broadcast %165 : vector<16x1xf32> to vector<16x32xf32>
    %167 = arith.mulf %162, %166 : vector<16x32xf32>
    %168 = vector.broadcast %138 : vector<1x32xf32> to vector<16x32xf32>
    %169 = arith.mulf %167, %168 : vector<16x32xf32>
    %170 = vector.broadcast %139 : vector<1x32xf32> to vector<16x32xf32>
    %171 = arith.addf %169, %170 : vector<16x32xf32>
    %172 = arith.truncf %171 : vector<16x32xf32> to vector<16x32xbf16>
    %cst_52 = arith.constant dense<0.000000e+00> : vector<16x96xf32>
    %173 = tpu.matmul %172, %146, %cst_52 {dimension_numbers = #tpu.dot_dimension_numbers<[1], [0], [0], [1], [0, 0, 1, 1], [], []>} : vector<16x32xbf16>, vector<32x96xbf16>, vector<16x96xf32> -> vector<16x96xf32>
    %174 = vector.broadcast %142 : vector<1x96xf32> to vector<16x96xf32>
    %175 = arith.addf %173, %174 : vector<16x96xf32>
    %176 = vector.extract_strided_slice %175 {offsets = [0, 0], sizes = [16, 32], strides = [1, 1]} : vector<16x96xf32> to vector<16x32xf32>
    %177 = vector.extract_strided_slice %175 {offsets = [0, 32], sizes = [16, 32], strides = [1, 1]} : vector<16x96xf32> to vector<16x32xf32>
    %178 = vector.extract_strided_slice %175 {offsets = [0, 64], sizes = [16, 32], strides = [1, 1]} : vector<16x96xf32> to vector<16x32xf32>
    %179 = vector.extract_strided_slice %176 {offsets = [0, 0], sizes = [16, 8], strides = [1, 1]} : vector<16x32xf32> to vector<16x8xf32>
    %180 = vector.shape_cast %179 : vector<16x8xf32> to vector<2x8x8xf32>
    %181 = vector.extract_strided_slice %176 {offsets = [0, 8], sizes = [16, 8], strides = [1, 1]} : vector<16x32xf32> to vector<16x8xf32>
    %182 = vector.shape_cast %181 : vector<16x8xf32> to vector<2x8x8xf32>
    %183 = vector.extract_strided_slice %176 {offsets = [0, 16], sizes = [16, 8], strides = [1, 1]} : vector<16x32xf32> to vector<16x8xf32>
    %184 = vector.shape_cast %183 : vector<16x8xf32> to vector<2x8x8xf32>
    %185 = vector.extract_strided_slice %176 {offsets = [0, 24], sizes = [16, 8], strides = [1, 1]} : vector<16x32xf32> to vector<16x8xf32>
    %186 = vector.shape_cast %185 : vector<16x8xf32> to vector<2x8x8xf32>
    %187 = tpu.concatenate %180, %182, %184, %186 in 0 : vector<2x8x8xf32>, vector<2x8x8xf32>, vector<2x8x8xf32>, vector<2x8x8xf32> -> vector<8x8x8xf32>
    %188 = vector.extract_strided_slice %177 {offsets = [0, 0], sizes = [16, 8], strides = [1, 1]} : vector<16x32xf32> to vector<16x8xf32>
    %189 = vector.shape_cast %188 : vector<16x8xf32> to vector<2x8x8xf32>
    %190 = vector.extract_strided_slice %177 {offsets = [0, 8], sizes = [16, 8], strides = [1, 1]} : vector<16x32xf32> to vector<16x8xf32>
    %191 = vector.shape_cast %190 : vector<16x8xf32> to vector<2x8x8xf32>
    %192 = vector.extract_strided_slice %177 {offsets = [0, 16], sizes = [16, 8], strides = [1, 1]} : vector<16x32xf32> to vector<16x8xf32>
    %193 = vector.shape_cast %192 : vector<16x8xf32> to vector<2x8x8xf32>
    %194 = vector.extract_strided_slice %177 {offsets = [0, 24], sizes = [16, 8], strides = [1, 1]} : vector<16x32xf32> to vector<16x8xf32>
    %195 = vector.shape_cast %194 : vector<16x8xf32> to vector<2x8x8xf32>
    %196 = tpu.concatenate %189, %191, %193, %195 in 0 : vector<2x8x8xf32>, vector<2x8x8xf32>, vector<2x8x8xf32>, vector<2x8x8xf32> -> vector<8x8x8xf32>
    %197 = vector.extract_strided_slice %178 {offsets = [0, 0], sizes = [16, 8], strides = [1, 1]} : vector<16x32xf32> to vector<16x8xf32>
    %198 = vector.shape_cast %197 : vector<16x8xf32> to vector<2x8x8xf32>
    %199 = vector.extract_strided_slice %178 {offsets = [0, 8], sizes = [16, 8], strides = [1, 1]} : vector<16x32xf32> to vector<16x8xf32>
    %200 = vector.shape_cast %199 : vector<16x8xf32> to vector<2x8x8xf32>
    %201 = vector.extract_strided_slice %178 {offsets = [0, 16], sizes = [16, 8], strides = [1, 1]} : vector<16x32xf32> to vector<16x8xf32>
    %202 = vector.shape_cast %201 : vector<16x8xf32> to vector<2x8x8xf32>
    %203 = vector.extract_strided_slice %178 {offsets = [0, 24], sizes = [16, 8], strides = [1, 1]} : vector<16x32xf32> to vector<16x8xf32>
    %204 = vector.shape_cast %203 : vector<16x8xf32> to vector<2x8x8xf32>
    %205 = tpu.concatenate %198, %200, %202, %204 in 0 : vector<2x8x8xf32>, vector<2x8x8xf32>, vector<2x8x8xf32>, vector<2x8x8xf32> -> vector<8x8x8xf32>
    "tpu.trace_start"() <{level = 10 : i32, message = "bqd,bkd->bqk"}> : () -> ()
    %cst_53 = arith.constant dense<0.000000e+00> : vector<8x8x8xf32>
    %206 = tpu.matmul %187, %196, %cst_53 {dimension_numbers = #tpu.dot_dimension_numbers<[2], [2], [1], [1], [0, 0, 0, 1, 1, 1], [0], [0]>} : vector<8x8x8xf32>, vector<8x8x8xf32>, vector<8x8x8xf32> -> vector<8x8x8xf32>
    "tpu.trace_stop"() : () -> ()
    %cst_54 = arith.constant 0.353553385 : f32
    %207 = vector.broadcast %cst_54 : f32 to vector<8x8x8xf32>
    %208 = arith.mulf %206, %207 : vector<8x8x8xf32>
    %cst_55 = arith.constant -1.000000e+30 : f32
    %209 = vector.shape_cast %4 : vector<1x8x8xi1> to vector<1x8x8xi1>
    %210 = vector.broadcast %209 : vector<1x8x8xi1> to vector<8x8x8xi1>
    %211 = vector.broadcast %cst_55 : f32 to vector<8x8x8xf32>
    %212 = arith.select %210, %211, %208 : vector<8x8x8xi1>, vector<8x8x8xf32>
    %cst_56 = arith.constant dense<0xFF800000> : vector<8x8xf32>
    %213 = vector.multi_reduction <maximumf>, %212, %cst_56 [2] : vector<8x8x8xf32> to vector<8x8xf32>
    %214 = vector.shape_cast %213 : vector<8x8xf32> to vector<8x8x1xf32>
    %215 = vector.broadcast %214 : vector<8x8x1xf32> to vector<8x8x8xf32>
    %216 = arith.subf %212, %215 : vector<8x8x8xf32>
    %217 = math.exp %216 : vector<8x8x8xf32>
    %cst_57 = arith.constant dense<0.000000e+00> : vector<8x8xf32>
    %218 = vector.multi_reduction <add>, %217, %cst_57 [2] : vector<8x8x8xf32> to vector<8x8xf32>
    %219 = vector.shape_cast %218 : vector<8x8xf32> to vector<8x8x1xf32>
    %220 = tpu.reciprocal %219 {approx = true} : vector<8x8x1xf32> -> vector<8x8x1xf32>
    %221 = vector.broadcast %220 : vector<8x8x1xf32> to vector<8x8x8xf32>
    %222 = arith.mulf %217, %221 : vector<8x8x8xf32>
    "tpu.trace_start"() <{level = 10 : i32, message = "bqk,bkd->bqd"}> : () -> ()
    %cst_58 = arith.constant dense<0.000000e+00> : vector<8x8x8xf32>
    %223 = tpu.matmul %222, %205, %cst_58 {dimension_numbers = #tpu.dot_dimension_numbers<[2], [1], [1], [2], [0, 0, 0, 1, 1, 2], [0], [0]>} : vector<8x8x8xf32>, vector<8x8x8xf32>, vector<8x8x8xf32> -> vector<8x8x8xf32>
    "tpu.trace_stop"() : () -> ()
    %224 = vector.extract_strided_slice %223 {offsets = [0, 0, 0], sizes = [2, 8, 8], strides = [1, 1, 1]} : vector<8x8x8xf32> to vector<2x8x8xf32>
    %225 = vector.shape_cast %224 : vector<2x8x8xf32> to vector<16x8xf32>
    %226 = vector.extract_strided_slice %223 {offsets = [2, 0, 0], sizes = [2, 8, 8], strides = [1, 1, 1]} : vector<8x8x8xf32> to vector<2x8x8xf32>
    %227 = vector.shape_cast %226 : vector<2x8x8xf32> to vector<16x8xf32>
    %228 = vector.extract_strided_slice %223 {offsets = [4, 0, 0], sizes = [2, 8, 8], strides = [1, 1, 1]} : vector<8x8x8xf32> to vector<2x8x8xf32>
    %229 = vector.shape_cast %228 : vector<2x8x8xf32> to vector<16x8xf32>
    %230 = vector.extract_strided_slice %223 {offsets = [6, 0, 0], sizes = [2, 8, 8], strides = [1, 1, 1]} : vector<8x8x8xf32> to vector<2x8x8xf32>
    %231 = vector.shape_cast %230 : vector<2x8x8xf32> to vector<16x8xf32>
    %232 = tpu.concatenate %225, %227, %229, %231 in 1 : vector<16x8xf32>, vector<16x8xf32>, vector<16x8xf32>, vector<16x8xf32> -> vector<16x32xf32>
    %233 = arith.truncf %232 : vector<16x32xf32> to vector<16x32xbf16>
    %cst_59 = arith.constant dense<0.000000e+00> : vector<16x32xf32>
    %234 = tpu.matmul %233, %147, %cst_59 {dimension_numbers = #tpu.dot_dimension_numbers<[1], [0], [0], [1], [0, 0, 1, 1], [], []>} : vector<16x32xbf16>, vector<32x32xbf16>, vector<16x32xf32> -> vector<16x32xf32>
    %235 = arith.addf %137, %234 : vector<16x32xf32>
    %236 = vector.broadcast %143 : vector<1x32xf32> to vector<16x32xf32>
    %237 = arith.addf %235, %236 : vector<16x32xf32>
    %cst_60 = arith.constant dense<0.000000e+00> : vector<16xf32>
    %238 = vector.multi_reduction <add>, %237, %cst_60 [1] : vector<16x32xf32> to vector<16xf32>
    %239 = vector.shape_cast %238 : vector<16xf32> to vector<16x1xf32>
    %cst_61 = arith.constant 3.200000e+01 : f32
    %240 = vector.broadcast %cst_61 : f32 to vector<16x1xf32>
    %241 = arith.divf %239, %240 : vector<16x1xf32>
    %242 = vector.broadcast %241 : vector<16x1xf32> to vector<16x32xf32>
    %243 = arith.subf %237, %242 : vector<16x32xf32>
    %244 = arith.mulf %243, %243 : vector<16x32xf32>
    %cst_62 = arith.constant dense<0.000000e+00> : vector<16xf32>
    %245 = vector.multi_reduction <add>, %244, %cst_62 [1] : vector<16x32xf32> to vector<16xf32>
    %246 = vector.shape_cast %245 : vector<16xf32> to vector<16x1xf32>
    %cst_63 = arith.constant 3.200000e+01 : f32
    %247 = vector.broadcast %cst_63 : f32 to vector<16x1xf32>
    %248 = arith.divf %246, %247 : vector<16x1xf32>
    %249 = vector.broadcast %241 : vector<16x1xf32> to vector<16x32xf32>
    %250 = arith.subf %237, %249 : vector<16x32xf32>
    %cst_64 = arith.constant 9.99999974E-6 : f32
    %251 = vector.broadcast %cst_64 : f32 to vector<16x1xf32>
    %252 = arith.addf %248, %251 : vector<16x1xf32>
    %253 = math.rsqrt %252 : vector<16x1xf32>
    %254 = vector.broadcast %253 : vector<16x1xf32> to vector<16x32xf32>
    %255 = arith.mulf %250, %254 : vector<16x32xf32>
    %256 = vector.broadcast %140 : vector<1x32xf32> to vector<16x32xf32>
    %257 = arith.mulf %255, %256 : vector<16x32xf32>
    %258 = vector.broadcast %141 : vector<1x32xf32> to vector<16x32xf32>
    %259 = arith.addf %257, %258 : vector<16x32xf32>
    %260 = arith.truncf %259 : vector<16x32xf32> to vector<16x32xbf16>
    %cst_65 = arith.constant dense<0.000000e+00> : vector<16x128xf32>
    %261 = tpu.matmul %260, %148, %cst_65 {dimension_numbers = #tpu.dot_dimension_numbers<[1], [0], [0], [1], [0, 0, 1, 1], [], []>} : vector<16x32xbf16>, vector<32x128xbf16>, vector<16x128xf32> -> vector<16x128xf32>
    %262 = vector.broadcast %144 : vector<1x128xf32> to vector<16x128xf32>
    %263 = arith.addf %261, %262 : vector<16x128xf32>
    %cst_66 = arith.constant 0.000000e+00 : f32
    %264 = vector.broadcast %cst_66 : f32 to vector<16x128xf32>
    %265 = arith.maximumf %263, %264 : vector<16x128xf32>
    %266 = arith.truncf %265 : vector<16x128xf32> to vector<16x128xbf16>
    %cst_67 = arith.constant dense<0.000000e+00> : vector<16x32xf32>
    %267 = tpu.matmul %266, %149, %cst_67 {dimension_numbers = #tpu.dot_dimension_numbers<[1], [0], [0], [1], [0, 0, 1, 1], [], []>} : vector<16x128xbf16>, vector<128x32xbf16>, vector<16x32xf32> -> vector<16x32xf32>
    %268 = arith.addf %237, %267 : vector<16x32xf32>
    %269 = vector.broadcast %145 : vector<1x32xf32> to vector<16x32xf32>
    %270 = arith.addf %268, %269 : vector<16x32xf32>
    %c448 = arith.constant 448 : index
    %c0_68 = arith.constant 0 : index
    %271 = vector.load %arg1[%c448, %c0_68] : memref<480x128xbf16, #tpu.memory_space<vmem>>, vector<32x128xbf16>
    %c16 = arith.constant 16 : index
    %c0_69 = arith.constant 0 : index
    %272 = vector.load %arg2[%c16, %c0_69] : memref<24x128xf32, #tpu.memory_space<vmem>>, vector<1x128xf32>
    %273 = arith.truncf %270 : vector<16x32xf32> to vector<16x32xbf16>
    %cst_70 = arith.constant dense<0.000000e+00> : vector<16x128xf32>
    %274 = tpu.matmul %273, %271, %cst_70 {dimension_numbers = #tpu.dot_dimension_numbers<[1], [0], [0], [1], [0, 0, 1, 1], [], []>} : vector<16x32xbf16>, vector<32x128xbf16>, vector<16x128xf32> -> vector<16x128xf32>
    %275 = vector.broadcast %272 : vector<1x128xf32> to vector<16x128xf32>
    %276 = arith.addf %274, %275 : vector<16x128xf32>
    %c0_71 = arith.constant 0 : index
    %c0_72 = arith.constant 0 : index
    %277 = vector.load %arg3[%c0_71, %c0_72] : memref<16x128xf32, #tpu.memory_space<vmem>>, vector<16x128xf32>
    tpu.vector_store %arg3[%c0_71, %c0_72], %276 {strides = array<i32>} : memref<16x128xf32, #tpu.memory_space<vmem>>, vector<16x128xf32>,
    return
  }
}

</mosaic_0001>

<bundles_post_ra>
// kernel: agpt_forward.1
= control target key start
LH: loop header
LB: loop body
LE: loop exit
PB: predicated region body
PF: predicated region fallthrough
CT: control target
= control target key end

     0   :  { %vm58_vm0 = vcmask 261120   ;;  %v4238_v15 = vmov 0.0   ;;  %vm4239_vm1 = vmmov 0   ;;  %s4240_s25 = smov 112   ;;  %s4241_s26 = smov 120   ;;  %vm175_vm2 = vcmask 64512   ;;  %s4926_s0 = inlined_call_operand.vmem [shape: f32[16,32], index: 0, kind: input, shape index: {}]   ;;  %s4927_s1 = inlined_call_operand.vmem [shape: bf16[480,128], index: 1, kind: input, shape index: {}]   ;;  %s4928_s2 = inlined_call_operand.vmem [shape: f32[24,128], index: 2, kind: input, shape index: {}]   ;;  %s4929_s3 = inlined_call_operand.vmem [shape: f32[16,128], index: 3, kind: output, shape index: {}]  }
   0x1   :  { %v4271_v0 = vld [vmem:[%s4926_s0] sm:$0xff]  ;;  %v4276_v1 = vld [vmem:[%s4926_s0 + $0x8] sm:$0xff]  ;;  %3832 = vmatprep.subr.bf16.mxu0 %v4238_v15  ;;  %3840 = vmatprep.subr.mxu1 %v4238_v15  ;;  %s4242_s27 = smov 104   ;;  %s4243_s28 = smov 96   ;;  %v17_v55 = vlaneseq  ;;  %vm1522_vm4 = vcmask 130048   ;;  %vm1525_vm5 = vcmask 195584  }
   0x2   :  { %v59_v2 = vsel %vm58_vm0, %v4271_v0, 0.0  ;;  %v62_v3 = vsel %vm58_vm0, %v4276_v1, 0.0  ;;  %v4128_v14 = vld [vmem:[%s4927_s1] sm:$0xff]   ;;  %v4129_v16 = vld [vmem:[%s4927_s1 + $0x8] sm:$0xff]   ;;  %3836 = vmatprep.mubr.msk.bf16.mxu0 %vm4239_vm1, %v4238_v15  ;;  %3842 = vmatprep.mubr.msk.f32.mxu1 %vm4239_vm1, %v4238_v15  ;;  %s4244_s29 = smov 64   ;;  %s4245_s7 = smov 8  }
   0x3   :  { %60 = vadd.xlane.f32.xlu0 %v59_v2  ;;  %3833 = vmatpush3.bf16.msra.mxu0 %v4128_v14  ;;  %v3627_v25 = vld [vmem:[%s4928_s2] ss:$0 sm:$0xff]  ;;  %v3628_v29 = vld [vmem:[%s4928_s2 + $0x1] ss:$0 sm:$0xff]  ;;  %v3629_v34 = vld [vmem:[%s4928_s2 + $0x4] ss:$0 sm:$0xff] }
   0x4   :  { %3834 = vmatprep.subr.bf16.mxu0 %v4238_v15  ;;  %v18_v56 = vshrl.u32 %v17_v55, 7  ;;  %v20_v57 = vand.u32 127, %v17_v55  ;;  %s4246_s8 = smov 16   ;;  %s4247_s9 = smov 24  }
   0x6   :  { %vm4404_vm3 = vcmp.gt.s32.totalorder %v20_v57, %v18_v56 }
   0x7   :  { %63 = vadd.xlane.f32.xlu0 %v62_v3  ;;  %3835 = vmatpush3.bf16.msra.mxu0 %v4129_v16 }
   0x8   :  { %3855 = vmatprep.subr.mxu0 %v4238_v15 }
  0x90   :  { %v61_v4 = vpop.xlane.xlu0 %60 }
  0x91   :  { %v66_v5 = vmul.f32 0.03125, %v61_v4 }
  0x93   :  { %v68_v6 = vsub.f32 %v4271_v0, %v66_v5 }
  0x94   :  { %v64_v7 = vpop.xlane.xlu0 %63 }
  0x95   :  { %v67_v8 = vmul.f32 0.03125, %v64_v7  ;;  %v70_v9 = vmul.f32 %v68_v6, %v68_v6 }
  0x97   :  { %v69_v10 = vsub.f32 %v4276_v1, %v67_v8  ;;  %v72_v11 = vsel %vm58_vm0, %v70_v9, 0.0 }
  0x98   :  { %73 = vadd.xlane.f32.xlu1 %v72_v11 }
  0x99   :  { %v71_v12 = vmul.f32 %v69_v10, %v69_v10 }
  0x9b   :  { %v75_v13 = vsel %vm58_vm0, %v71_v12, 0.0 }
  0x9c   :  { %76 = vadd.xlane.f32.xlu1 %v75_v13 }
 0x125   :  { %v74_v17 = vpop.xlane.xlu1 %73 }
 0x126   :  { %v78_v18 = vmul.f32 0.03125, %v74_v17 }
 0x128   :  { %v80_v19 = vadd.f32 1e-05, %v78_v18 }
 0x129   :  { %v77_v20 = vpop.xlane.xlu1 %76 }
 0x12a   :  { %4158 = vrsqrt.f32 %v80_v19  ;;  %v79_v21 = vmul.f32 0.03125, %v77_v20 }
 0x12c   :  { %v81_v22 = vadd.f32 1e-05, %v79_v21 }
 0x12e   :  { %4160 = vrsqrt.f32 %v81_v22 }
 0x134   :  { %v4159_v23 = vpop.eup %4158 }
 0x135   :  { %v84_v24 = vmul.f32 %v4159_v23, %v68_v6 }
 0x137   :  { %v90_v28 = vmul.f32 %v3627_v25, %v84_v24 }
 0x138   :  { %v4161_v26 = vpop.eup %4160 }
 0x139   :  { %v85_v27 = vmul.f32 %v4161_v26, %v69_v10  ;;  %v96_v31 = vadd.f32 %v3628_v29, %v90_v28 }
 0x13b   :  { %v91_v30 = vmul.f32 %v3627_v25, %v85_v27 }
 0x13d   :  { %v97_v32 = vadd.f32 %v3628_v29, %v91_v30 }
 0x13f   :  { %v98_v33 = vpack.c.bf16 %v97_v32, %v96_v31 }
 0x141   :  { %3837 = vmatmul.mubr.msk.bf16.vlgmr.msra.gmra.mrb[0].mxu0 %vm58_vm0, %v98_v33 }
 0x142   :  { %3857 = vmatprep.mubr.msk.f32.mxu0 %vm4239_vm1, %v4238_v15 }
 0x214   :  { %v152_v35 = vpop.f32.mrb[0].mxu0 }
 0x215   :  { %v4312_v36 = vadd.f32 %v3629_v34, %v152_v35  ;;  %v3838_v37 = vpop.f32.mrb[1].mxu0 }
 0x216   :  { %v155_v38 = vpop.f32.mrb[2].mxu0 }
 0x217   :  { %165 = vrot.lane.b32.xlu1 %v4312_v36, %s4240_s25  ;;  %161 = vrot.lane.b32.xlu0 %v4312_v36, %s4241_s26  ;;  %v3839_v39 = vpop.f32.mrb[3].mxu0  ;;  %v4318_v40 = vadd.f32 %v3629_v34, %v155_v38 }
 0x21b   :  { %169 = vrot.lane.b32.xlu0 %v4312_v36, %s4242_s27  ;;  %163 = vrot.lane.b32.xlu1 %v4318_v40, %s4241_s26 }
 0x21f   :  { %173 = vrot.lane.b32.xlu0 %v4312_v36, %s4243_s28  ;;  %167 = vrot.lane.b32.xlu1 %v4318_v40, %s4240_s25 }
 0x223   :  { %171 = vrot.lane.b32.xlu1 %v4318_v40, %s4242_s27 }
 0x227   :  { %250 = vrot.lane.b32.xlu1 %v4318_v40, %s4243_s28 }
 0x289   :  { %v4332_v41 = vpop.permute.xlu1 %165  ;;  %v4334_v42 = vpop.permute.xlu0 %161 }
 0x28a   :  { %326 = vrot.lane.b32.xlu0 %v4334_v42, %s4243_s28 }
 0x28d   :  { %v4338_v43 = vpop.permute.xlu0 %169  ;;  %v4340_v44 = vpop.permute.xlu1 %163 }
 0x28e   :  { %478 = vrot.lane.b32.xlu0 %v4332_v41, %s4243_s28  ;;  %402 = vrot.lane.b32.xlu1 %v4340_v44, %s4243_s28 }
 0x291   :  { %v174_v45 = vpop.permute.xlu0 %173  ;;  %v4346_v46 = vpop.permute.xlu1 %167 }
 0x292   :  { %630 = vrot.lane.b32.xlu0 %v4338_v43, %s4243_s28  ;;  %3841 = vmatpush3.xpose.msk.msra.mxu1 %vm175_vm2, %v174_v45 }
 0x293   :  { %554 = vrot.lane.b32.xlu1 %v4346_v46, %s4243_s28  ;;  %3845 = vmatprep.subr.mxu1 %v4238_v15 }
 0x295   :  { %3843 = vmatmul.mubr.msk.f32.vlgmr.msra.gmra.mrb[0].mxu1 %vm175_vm2, %v4312_v36  ;;  %v4356_v47 = vpop.permute.xlu1 %171 }
 0x296   :  { %3847 = vmatprep.mubr.msk.f32.mxu1 %vm4239_vm1, %v4238_v15 }
 0x297   :  { %706 = vrot.lane.b32.xlu1 %v4356_v47, %s4243_s28 }
 0x299   :  { %v251_v48 = vpop.permute.xlu1 %250 }
 0x29a   :  { %3846 = vmatpush3.xpose.msk.msra.mxu1 %vm175_vm2, %v251_v48 }
 0x29b   :  { %3850 = vmatprep.subr.mxu1 %v4238_v15 }
 0x29d   :  { %3848 = vmatmul.mubr.msk.f32.vlgmr.msra.gmra.mrb[2].mxu1 %vm175_vm2, %v4318_v40 }
 0x29e   :  { %3852 = vmatprep.mubr.msk.f32.mxu1 %vm4239_vm1, %v4238_v15 }
 0x2fc   :  { %v327_v49 = vpop.permute.xlu0 %326 }
 0x2fd   :  { %3851 = vmatpush3.xpose.msk.msra.mxu1 %vm175_vm2, %v327_v49 }
 0x2fe   :  { %3860 = vmatprep.subr.mxu1 %v4238_v15 }
 0x300   :  { %v479_v50 = vpop.permute.xlu0 %478  ;;  %3853 = vmatmul.mubr.msk.f32.vlgmr.msra.gmra.mrb[4].mxu1 %vm175_vm2, %v4334_v42  ;;  %v403_v51 = vpop.permute.xlu1 %402 }
 0x301   :  { %3856 = vmatpush3.xpose.msk.msra.mxu0 %vm175_vm2, %v403_v51  ;;  %3861 = vmatpush3.xpose.msk.msra.mxu1 %vm175_vm2, %v479_v50 }
 0x302   :  { %3862 = vmatprep.mubr.msk.f32.mxu1 %vm4239_vm1, %v4238_v15  ;;  %3865 = vmatprep.subr.mxu0 %v4238_v15 }
 0x303   :  { %3870 = vmatprep.subr.mxu1 %v4238_v15 }
 0x304   :  { %v631_v52 = vpop.permute.xlu0 %630  ;;  %3858 = vmatmul.mubr.msk.f32.vlgmr.msra.gmra.mrb[4].mxu0 %vm175_vm2, %v4340_v44  ;;  %3863 = vmatmul.mubr.msk.f32.vlgmr.msra.gmra.mrb[6].mxu1 %vm175_vm2, %v4332_v41 }
 0x305   :  { %v555_v53 = vpop.permute.xlu1 %554  ;;  %3871 = vmatpush3.xpose.msk.msra.mxu1 %vm175_vm2, %v631_v52  ;;  %3867 = vmatprep.mubr.msk.f32.mxu0 %vm4239_vm1, %v4238_v15 }
 0x306   :  { %3866 = vmatpush3.xpose.msk.msra.mxu0 %vm175_vm2, %v555_v53  ;;  %3872 = vmatprep.mubr.msk.f32.mxu1 %vm4239_vm1, %v4238_v15 }
 0x307   :  { %3875 = vmatprep.subr.mxu0 %v4238_v15  ;;  %3880 = vmatprep.subr.mxu1 %v4238_v15 }
 0x308   :  { %3873 = vmatmul.mubr.msk.f32.vlgmr.msra.gmra.mrb[8].mxu1 %vm175_vm2, %v4338_v43 }
 0x309   :  { %3868 = vmatmul.mubr.msk.f32.vlgmr.msra.gmra.mrb[6].mxu0 %vm175_vm2, %v4346_v46  ;;  %v707_v54 = vpop.permute.xlu1 %706  ;;  %3882 = vmatprep.mubr.msk.f32.mxu1 %vm4239_vm1, %v4238_v15 }
 0x30a   :  { %3876 = vmatpush3.xpose.msk.msra.mxu0 %vm175_vm2, %v707_v54  ;;  %3877 = vmatprep.mubr.msk.f32.mxu0 %vm4239_vm1, %v4238_v15 }
 0x30b   :  { %3885 = vmatprep.subr.mxu0 %v4238_v15 }
 0x30d   :  { %3878 = vmatmul.mubr.msk.f32.vlgmr.msra.gmra.mrb[8].mxu0 %vm175_vm2, %v4356_v47 }
 0x30e   :  { %3887 = vmatprep.mubr.msk.f32.mxu0 %vm4239_vm1, %v4238_v15 }
 0x368   :  { %v246_v58 = vpop.f32.mrb[0].mxu1 }
 0x369   :  { %v782_v60 = vmul.f32 0.35355338, %v246_v58  ;;  %v3844_v61 = vpop.f32.mrb[1].mxu1 }
 0x36b   :  { %v792_v62 = vsel %vm4404_vm3, -1e+30, %v782_v60 }
 0x36c   :  { %v800_v63 = vsel %vm175_vm2, %v792_v62, -inf }
 0x36d   :  { %801 = vmax.xlane.f32.xlu0 %v800_v63 }
 0x370   :  { %v322_v2 = vpop.f32.mrb[2].mxu1 }
 0x371   :  { %v783_v3 = vmul.f32 0.35355338, %v322_v2  ;;  %v3849_v4 = vpop.f32.mrb[3].mxu1 }
 0x373   :  { %v793_v5 = vsel %vm4404_vm3, -1e+30, %v783_v3 }
 0x374   :  { %v803_v6 = vsel %vm175_vm2, %v793_v5, -inf }
 0x375   :  { %804 = vmax.xlane.f32.xlu1 %v803_v6 }
 0x3d3   :  { %v398_v7 = vpop.f32.mrb[4].mxu1 }
 0x3d4   :  { %v784_v8 = vmul.f32 0.35355338, %v398_v7  ;;  %v3854_v9 = vpop.f32.mrb[5].mxu1 }
 0x3d6   :  { %v794_v10 = vsel %vm4404_vm3, -1e+30, %v784_v8 }
 0x3d7   :  { %v474_v11 = vpop.f32.mrb[4].mxu0  ;;  %v550_v12 = vpop.f32.mrb[6].mxu1  ;;  %v806_v13 = vsel %vm175_vm2, %v794_v10, -inf }
 0x3d8   :  { %v785_v14 = vmul.f32 0.35355338, %v474_v11  ;;  %v786_v16 = vmul.f32 0.35355338, %v550_v12  ;;  %807 = vmax.xlane.f32.xlu0 %v806_v13  ;;  %v3859_v17 = vpop.f32.mrb[5].mxu0  ;;  %v3864_v18 = vpop.f32.mrb[7].mxu1 }
 0x3da   :  { %v795_v19 = vsel %vm4404_vm3, -1e+30, %v785_v14  ;;  %v796_v25 = vsel %vm4404_vm3, -1e+30, %v786_v16 }
 0x3db   :  { %v702_v20 = vpop.f32.mrb[8].mxu1  ;;  %v809_v21 = vsel %vm175_vm2, %v795_v19, -inf  ;;  %v812_v28 = vsel %vm175_vm2, %v796_v25, -inf }
 0x3dc   :  { %v626_v22 = vpop.f32.mrb[6].mxu0  ;;  %v788_v23 = vmul.f32 0.35355338, %v702_v20  ;;  %v3874_v24 = vpop.f32.mrb[9].mxu1  ;;  %810 = vmax.xlane.f32.xlu0 %v809_v21 }
 0x3dd   :  { %v787_v26 = vmul.f32 0.35355338, %v626_v22  ;;  %v3869_v27 = vpop.f32.mrb[7].mxu0 }
 0x3de   :  { %v798_v32 = vsel %vm4404_vm3, -1e+30, %v788_v23 }
 0x3df   :  { %v797_v29 = vsel %vm4404_vm3, -1e+30, %v787_v26  ;;  %v818_v35 = vsel %vm175_vm2, %v798_v32, -inf }
 0x3e0   :  { %v778_v30 = vpop.f32.mrb[8].mxu0  ;;  %813 = vmax.xlane.f32.xlu0 %v812_v28  ;;  %v815_v31 = vsel %vm175_vm2, %v797_v29, -inf }
 0x3e1   :  { %v789_v33 = vmul.f32 0.35355338, %v778_v30  ;;  %816 = vmax.xlane.f32.xlu1 %v815_v31  ;;  %v3879_v34 = vpop.f32.mrb[9].mxu0 }
 0x3e3   :  { %v799_v37 = vsel %vm4404_vm3, -1e+30, %v789_v33 }
 0x3e4   :  { %819 = vmax.xlane.f32.xlu0 %v818_v35  ;;  %v821_v38 = vsel %vm175_vm2, %v799_v37, -inf }
 0x3e5   :  { %822 = vmax.xlane.f32.xlu1 %v821_v38 }
 0x3f6   :  { %964 = vrot.lane.b32.xlu1 %v4318_v40, %s4244_s29 }
 0x3fa   :  { %1040 = vrot.lane.b32.xlu1 %v4334_v42, %s4244_s29  ;;  %888 = vrot.lane.b32.xlu0 %v4312_v36, %s4244_s29  ;;  %v802_v39 = vpop.xlane.xlu0 %801 }
 0x3fb   :  { %v824_v45 = vsub.f32 %v792_v62, %v802_v39 }
 0x3fd   :  { %v832_v48 = vmul.f32 1.442695, %v824_v45 }
 0x3fe   :  { %1116 = vrot.lane.b32.xlu1 %v4340_v44, %s4244_s29  ;;  %1192 = vrot.lane.b32.xlu0 %v4332_v41, %s4244_s29 }
 0x3ff   :  { %4162 = vpow2.f32 %v832_v48 }
 0x402   :  { %1268 = vrot.lane.b32.xlu1 %v4346_v46, %s4244_s29  ;;  %v805_v49 = vpop.xlane.xlu1 %804 }
 0x403   :  { %v825_v40 = vsub.f32 %v793_v5, %v805_v49 }
 0x405   :  { %v834_v50 = vmul.f32 1.442695, %v825_v40 }
 0x407   :  { %4164 = vpow2.f32 %v834_v50 }
 0x409   :  { %v4444_v42 = vpop.eup %4162 }
 0x40a   :  { %v848_v36 = vsel %vm175_vm2, %v4444_v42, 0.0 }
 0x411   :  { %v4448_v44 = vpop.eup %4164 }
 0x412   :  { %v851_v41 = vsel %vm175_vm2, %v4448_v44, 0.0 }
 0x41d   :  { %849 = vadd.xlane.f32.xlu0 %v848_v36 }
 0x426   :  { %852 = vadd.xlane.f32.xlu1 %v851_v41 }
 0x465   :  { %v808_v46 = vpop.xlane.xlu0 %807 }
 0x466   :  { %v826_v51 = vsub.f32 %v794_v10, %v808_v46 }
 0x468   :  { %v836_v52 = vmul.f32 1.442695, %v826_v51 }
 0x469   :  { %v811_v53 = vpop.xlane.xlu0 %810 }
 0x46a   :  { %4166 = vpow2.f32 %v836_v52  ;;  %v827_v54 = vsub.f32 %v795_v19, %v811_v53 }
 0x46c   :  { %v838_v55 = vmul.f32 1.442695, %v827_v54 }
 0x46d   :  { %v814_v56 = vpop.xlane.xlu0 %813 }
 0x46e   :  { %4168 = vpow2.f32 %v838_v55  ;;  %v828_v57 = vsub.f32 %v796_v25, %v814_v56  ;;  %v817_v58 = vpop.xlane.xlu1 %816 }
 0x46f   :  { %v829_v60 = vsub.f32 %v797_v29, %v817_v58 }
 0x470   :  { %v840_v61 = vmul.f32 1.442695, %v828_v57  ;;  %v4130_v57 = vld [vmem:[%s4927_s1 + $0x10] sm:$0xff]  }
 0x471   :  { %v842_v62 = vmul.f32 1.442695, %v829_v60  ;;  %v820_v63 = vpop.xlane.xlu0 %819 }
 0x472   :  { %4170 = vpow2.f32 %v840_v61  ;;  %v830_v2 = vsub.f32 %v798_v32, %v820_v63  ;;  %v823_v3 = vpop.xlane.xlu1 %822  ;;  %v4131_v61 = vld [vmem:[%s4927_s1 + $0x18] sm:$0xff]  }
 0x473   :  { %4172 = vpow2.f32 %v842_v62  ;;  %v831_v4 = vsub.f32 %v799_v37, %v823_v3 }
 0x474   :  { %v4167_v5 = vpop.eup %4166  ;;  %v844_v6 = vmul.f32 1.442695, %v830_v2 }
 0x475   :  { %v846_v7 = vmul.f32 1.442695, %v831_v4  ;;  %v889_v8 = vpop.permute.xlu0 %888  ;;  %v854_v9 = vsel %vm175_vm2, %v4167_v5, 0.0 }
 0x476   :  { %4174 = vpow2.f32 %v844_v6  ;;  %v965_v10 = vpop.permute.xlu1 %964  ;;  %855 = vadd.xlane.f32.xlu0 %v854_v9  ;;  %3881 = vmatpush3.msra.mxu1 %v889_v8 }
 0x477   :  { %4176 = vpow2.f32 %v846_v7  ;;  %3886 = vmatpush3.msra.mxu0 %v965_v10  ;;  %3890 = vmatprep.subr.mxu1 %v4238_v15 }
 0x478   :  { %v4169_v11 = vpop.eup %4168  ;;  %3895 = vmatprep.subr.mxu0 %v4238_v15 }
 0x479   :  { %v857_v12 = vsel %vm175_vm2, %v4169_v11, 0.0  ;;  %v1193_v23 = vpop.permute.xlu0 %1192 }
 0x47a   :  { %858 = vadd.xlane.f32.xlu1 %v857_v12  ;;  %v1041_v22 = vpop.permute.xlu1 %1040 }
 0x47c   :  { %v4171_v13 = vpop.eup %4170 }
 0x47d   :  { %v4173_v14 = vpop.eup %4172  ;;  %v860_v16 = vsel %vm175_vm2, %v4171_v13, 0.0 }
 0x47e   :  { %861 = vadd.xlane.f32.xlu0 %v860_v16  ;;  %v863_v17 = vsel %vm175_vm2, %v4173_v14, 0.0  ;;  %v1117_v24 = vpop.permute.xlu1 %1116 }
 0x47f   :  { %864 = vadd.xlane.f32.xlu1 %v863_v17 }
 0x480   :  { %v4458_v18 = vpop.eup %4174 }
 0x481   :  { %v4460_v19 = vpop.eup %4176  ;;  %v866_v20 = vsel %vm175_vm2, %v4458_v18, 0.0 }
 0x482   :  { %867 = vadd.xlane.f32.xlu0 %v866_v20  ;;  %v869_v21 = vsel %vm175_vm2, %v4460_v19, 0.0  ;;  %v1269_v26 = vpop.permute.xlu1 %1268 }
 0x483   :  { %870 = vadd.xlane.f32.xlu1 %v869_v21 }
 0x494   :  { %1420 = vrot.lane.b32.xlu1 %v4356_v47, %s4244_s29 }
 0x498   :  { %1344 = vrot.lane.b32.xlu0 %v4338_v43, %s4244_s29 }
 0x4aa   :  { %v850_v25 = vpop.xlane.xlu0 %849 }
 0x4ab   :  { %4178 = vrcp.f32 %v850_v25 }
 0x4b3   :  { %v853_v27 = vpop.xlane.xlu1 %852 }
 0x4b4   :  { %4180 = vrcp.f32 %v853_v27 }
 0x4b5   :  { %v4179_v28 = vpop.eup %4178 }
 0x4b6   :  { %v880_v29 = vmul.f32 %v4179_v28, %v4444_v42 }
 0x4b8   :  { %3883 = vmatmul.mubr.msk.f32.vlgmr.msra.gmra.mrb[10].mxu1 %vm175_vm2, %v880_v29  ;;  %v3660_v29 = vld [vmem:[%s4928_s2 + $0x5] ss:$0 sm:$0xff] }
 0x4b9   :  { %3891 = vmatpush3.msra.mxu1 %v1041_v22  ;;  %3892 = vmatprep.mubr.msk.f32.mxu1 %vm4239_vm1, %v4238_v15 }
 0x4ba   :  { %3900 = vmatprep.subr.mxu1 %v4238_v15 }
 0x4be   :  { %v4181_v43 = vpop.eup %4180 }
 0x4bf   :  { %v881_v47 = vmul.f32 %v4181_v43, %v4448_v44 }
 0x4c1   :  { %3888 = vmatmul.mubr.msk.f32.vlgmr.msra.gmra.mrb[10].mxu0 %vm175_vm2, %v881_v47 }
 0x4c2   :  { %3896 = vmatpush3.msra.mxu0 %v1117_v24  ;;  %3897 = vmatprep.mubr.msk.f32.mxu0 %vm4239_vm1, %v4238_v15 }
 0x4c3   :  { %3905 = vmatprep.subr.mxu0 %v4238_v15 }
 0x503   :  { %v856_v30 = vpop.xlane.xlu0 %855 }
 0x504   :  { %4182 = vrcp.f32 %v856_v30 }
 0x507   :  { %v859_v31 = vpop.xlane.xlu1 %858 }
 0x508   :  { %4184 = vrcp.f32 %v859_v31 }
 0x50b   :  { %v862_v32 = vpop.xlane.xlu0 %861 }
 0x50c   :  { %4186 = vrcp.f32 %v862_v32  ;;  %v865_v33 = vpop.xlane.xlu1 %864 }
 0x50d   :  { %4188 = vrcp.f32 %v865_v33 }
 0x50e   :  { %v4183_v34 = vpop.eup %4182 }
 0x50f   :  { %v882_v35 = vmul.f32 %v4183_v34, %v4167_v5  ;;  %v868_v37 = vpop.xlane.xlu0 %867 }
 0x510   :  { %4190 = vrcp.f32 %v868_v37  ;;  %v871_v38 = vpop.xlane.xlu1 %870 }
 0x511   :  { %4192 = vrcp.f32 %v871_v38  ;;  %3893 = vmatmul.mubr.msk.f32.vlgmr.msra.gmra.mrb[12].mxu1 %vm175_vm2, %v882_v35 }
 0x512   :  { %v4185_v39 = vpop.eup %4184  ;;  %3901 = vmatpush3.msra.mxu1 %v1193_v23  ;;  %3902 = vmatprep.mubr.msk.f32.mxu1 %vm4239_vm1, %v4238_v15 }
 0x513   :  { %v883_v45 = vmul.f32 %v4185_v39, %v4169_v11  ;;  %3910 = vmatprep.subr.mxu1 %v4238_v15  ;;  %v1345_v42 = vpop.permute.xlu0 %1344 }
 0x514   :  { %v1421_v44 = vpop.permute.xlu1 %1420 }
 0x515   :  { %3898 = vmatmul.mubr.msk.f32.vlgmr.msra.gmra.mrb[12].mxu0 %vm175_vm2, %v883_v45 }
 0x516   :  { %v4187_v48 = vpop.eup %4186  ;;  %3906 = vmatpush3.msra.mxu0 %v1269_v26  ;;  %3907 = vmatprep.mubr.msk.f32.mxu0 %vm4239_vm1, %v4238_v15 }
 0x517   :  { %v4189_v49 = vpop.eup %4188  ;;  %v884_v40 = vmul.f32 %v4187_v48, %v4171_v13  ;;  %3915 = vmatprep.subr.mxu0 %v4238_v15 }
 0x518   :  { %v885_v50 = vmul.f32 %v4189_v49, %v4173_v14 }
 0x519   :  { %3903 = vmatmul.mubr.msk.f32.vlgmr.msra.gmra.mrb[14].mxu1 %vm175_vm2, %v884_v40 }
 0x51a   :  { %v4191_v36 = vpop.eup %4190  ;;  %3908 = vmatmul.mubr.msk.f32.vlgmr.msra.gmra.mrb[14].mxu0 %vm175_vm2, %v885_v50  ;;  %3911 = vmatpush3.msra.mxu1 %v1345_v42 }
 0x51b   :  { %v4193_v41 = vpop.eup %4192  ;;  %v886_v46 = vmul.f32 %v4191_v36, %v4458_v18  ;;  %3916 = vmatpush3.msra.mxu0 %v1421_v44  ;;  %3912 = vmatprep.mubr.msk.f32.mxu1 %vm4239_vm1, %v4238_v15  ;;  %v4132_v44 = vld [vmem:[%s4927_s1 + $0x20] sm:$0xff]  }
 0x51c   :  { %v887_v51 = vmul.f32 %v4193_v41, %v4460_v19  ;;  %3917 = vmatprep.mubr.msk.f32.mxu0 %vm4239_vm1, %v4238_v15  ;;  %3920 = vmatprep.subr.bf16.mxu0 %v4238_v15  ;;  %v4133_v41 = vld [vmem:[%s4927_s1 + $0x28] sm:$0xff]  }
 0x51d   :  { %3913 = vmatmul.mubr.msk.f32.vlgmr.msra.gmra.mrb[16].mxu1 %vm175_vm2, %v886_v46  ;;  %3936 = vmatprep.subr.bf16.mxu1 %v4238_v15  ;;  %v4134_v46 = vld [vmem:[%s4927_s1 + $0x30] sm:$0xff]  }
 0x51e   :  { %3918 = vmatmul.mubr.msk.f32.vlgmr.msra.gmra.mrb[16].mxu0 %vm175_vm2, %v887_v51  ;;  %3952 = vmatprep.mubr.msk.bf16.mxu1 %vm4239_vm1, %v4238_v15  ;;  %v4135_v51 = vld [vmem:[%s4927_s1 + $0x38] sm:$0xff]  }
 0x51f   :  { %3924 = vmatprep.mubr.msk.bf16.mxu0 %vm4239_vm1, %v4238_v15  ;;  %3921 = vmatpush3.bf16.msra.mxu0 %v4130_v57 }
 0x520   :  { %3922 = vmatprep.subr.bf16.mxu0 %v4238_v15  ;;  %3937 = vmatpush3.bf16.msra.mxu1 %v4134_v46 }
 0x521   :  { %3938 = vmatprep.subr.bf16.mxu1 %v4238_v15 }
 0x523   :  { %3923 = vmatpush3.bf16.msra.mxu0 %v4131_v61 }
 0x524   :  { %3928 = vmatprep.subr.bf16.mxu0 %v4238_v15  ;;  %3939 = vmatpush3.bf16.msra.mxu1 %v4135_v51 }
 0x525   :  { %3940 = vmatprep.subr.bf16.mxu1 %v4238_v15 }
 0x58b   :  { %v960_v52 = vpop.f32.mrb[10].mxu1 }
 0x58c   :  { %v3884_v53 = vpop.f32.mrb[11].mxu1 }
 0x58d   :  { %v4137_v53 = vld [vmem:[%s4927_s1 + $0x48] sm:$0xff]  }
 0x594   :  { %v1036_v54 = vpop.f32.mrb[10].mxu0 }
 0x595   :  { %v3889_v55 = vpop.f32.mrb[11].mxu0 }
 0x596   :  { %v4139_v55 = vld [vmem:[%s4927_s1 + $0x58] sm:$0xff]  }
 0x5e4   :  { %v1112_v56 = vpop.f32.mrb[12].mxu1 }
 0x5e5   :  { %v3894_v58 = vpop.f32.mrb[13].mxu1 }
 0x5e8   :  { %v1188_v60 = vpop.f32.mrb[12].mxu0 }
 0x5e9   :  { %v4098_v62 = vpack.i.bf16 %v1188_v60, %v1112_v56  ;;  %v3899_v63 = vpop.f32.mrb[13].mxu0 }
 0x5eb   :  { %4099 = vrot.lane.b32.xlu0 %v4098_v62, %s4245_s7 }
 0x5ec   :  { %v1264_v2 = vpop.f32.mrb[14].mxu1 }
 0x5ed   :  { %v1340_v3 = vpop.f32.mrb[14].mxu0  ;;  %v3904_v4 = vpop.f32.mrb[15].mxu1 }
 0x5ee   :  { %v4103_v5 = vpack.i.bf16 %v1340_v3, %v1264_v2  ;;  %v3909_v6 = vpop.f32.mrb[15].mxu0  ;;  %v3661_v3 = vld [vmem:[%s4928_s2 + $0x2] ss:$0 sm:$0xff] }
 0x5f0   :  { %4104 = vrot.lane.b32.xlu1 %v4103_v5, %s4246_s8  ;;  %v1416_v7 = vpop.f32.mrb[16].mxu1 }
 0x5f1   :  { %v1492_v8 = vpop.f32.mrb[16].mxu0  ;;  %v3914_v9 = vpop.f32.mrb[17].mxu1 }
 0x5f2   :  { %v4108_v10 = vpack.i.bf16 %v1492_v8, %v1416_v7  ;;  %v3919_v11 = vpop.f32.mrb[17].mxu0  ;;  %v3662_v7 = vld [vmem:[%s4928_s2 + $0x3] ss:$0 sm:$0xff] }
 0x5f4   :  { %4109 = vrot.lane.b32.xlu0 %v4108_v10, %s4247_s9 }
 0x65d   :  { %v4100_v12 = vpop.permute.xlu0 %4099 }
 0x65e   :  { %v4102_v14 = vunpack.i.h.bf16 %v4100_v12  ;;  %v4101_v16 = vunpack.i.l.bf16 %v4100_v12  ;;  %v4140_v12 = vld [vmem:[%s4927_s1 + $0x60] sm:$0xff]  }
 0x660   :  { %v1521_v20 = vsel %vm175_vm2, %v1036_v54, %v4102_v14  ;;  %v1520_v21 = vsel %vm175_vm2, %v960_v52, %v4101_v16  ;;  %v4136_v52 = vld [vmem:[%s4927_s1 + $0x40] sm:$0xff]   ;;  %v4138_v54 = vld [vmem:[%s4927_s1 + $0x50] sm:$0xff]  }
 0x661   :  { %3941 = vmatpush3.bf16.msra.mxu1 %v4136_v52  ;;  %v3663_v14 = vld [vmem:[%s4928_s2 + $0x6] ss:$0 sm:$0xff] }
 0x662   :  { %v4105_v13 = vpop.permute.xlu1 %4104  ;;  %3942 = vmatprep.subr.bf16.mxu1 %v4238_v15 }
 0x663   :  { %v4107_v17 = vunpack.i.h.bf16 %v4105_v13  ;;  %v4106_v18 = vunpack.i.l.bf16 %v4105_v13  ;;  %v4141_v13 = vld [vmem:[%s4927_s1 + $0x68] sm:$0xff]  }
 0x665   :  { %v1524_v24 = vsel %vm1522_vm4, %v1521_v20, %v4107_v17  ;;  %v1523_v25 = vsel %vm1522_vm4, %v1520_v21, %v4106_v18  ;;  %3943 = vmatpush3.bf16.msra.mxu1 %v4137_v53  ;;  %v3676_v53 = vld [vmem:[%s4928_s2 + $0x8] ss:$0 sm:$0xff] }
 0x666   :  { %v4110_v19 = vpop.permute.xlu0 %4109  ;;  %3944 = vmatprep.subr.bf16.mxu1 %v4238_v15 }
 0x667   :  { %v4112_v22 = vunpack.i.h.bf16 %v4110_v19  ;;  %v4111_v23 = vunpack.i.l.bf16 %v4110_v19 }
 0x669   :  { %v1527_v26 = vsel %vm1525_vm5, %v1524_v24, %v4112_v22  ;;  %v1526_v27 = vsel %vm1525_vm5, %v1523_v25, %v4111_v23  ;;  %3945 = vmatpush3.bf16.msra.mxu1 %v4138_v54  ;;  %v3675_v25 = vld [vmem:[%s4928_s2 + $0x7] ss:$0 sm:$0xff] }
 0x66a   :  { %v1528_v28 = vpack.c.bf16 %v1527_v26, %v1526_v27  ;;  %3946 = vmatprep.subr.bf16.mxu1 %v4238_v15 }
 0x66c   :  { %3925 = vmatmul.mubr.msk.bf16.vlgmr.msra.gmra.mrb[20].mxu0 %vm58_vm0, %v1528_v28 }
 0x66d   :  { %3932 = vmatprep.mubr.msk.bf16.mxu0 %vm4239_vm1, %v4238_v15  ;;  %3929 = vmatpush3.bf16.msra.mxu0 %v4132_v44 }
 0x66e   :  { %3930 = vmatprep.subr.bf16.mxu0 %v4238_v15  ;;  %3947 = vmatpush3.bf16.msra.mxu1 %v4139_v55 }
 0x66f   :  { %3948 = vmatprep.subr.bf16.mxu1 %v4238_v15 }
 0x671   :  { %3931 = vmatpush3.bf16.msra.mxu0 %v4133_v41 }
 0x672   :  { %3956 = vmatprep.subr.bf16.mxu0 %v4238_v15  ;;  %3949 = vmatpush3.bf16.msra.mxu1 %v4140_v12 }
 0x673   :  { %3950 = vmatprep.subr.bf16.mxu1 %v4238_v15 }
 0x676   :  { %3951 = vmatpush3.bf16.msra.mxu1 %v4141_v13 }
 0x677   :  { %3994 = vmatprep.subr.mxu1 %v4238_v15 }
 0x73f   :  { %v1578_v43 = vpop.f32.mrb[20].mxu0 }
 0x740   :  { %v1585_v47 = vadd.f32 %v1578_v43, %v4271_v0  ;;  %v3926_v30 = vpop.f32.mrb[21].mxu0 }
 0x741   :  { %v1581_v31 = vpop.f32.mrb[22].mxu0 }
 0x742   :  { %v4528_v32 = vadd.f32 %v3660_v29, %v1585_v47  ;;  %v1586_v33 = vadd.f32 %v1581_v31, %v4276_v1  ;;  %v3927_v34 = vpop.f32.mrb[23].mxu0 }
 0x744   :  { %v4531_v35 = vadd.f32 %v3660_v29, %v1586_v33  ;;  %v1593_v37 = vsel %vm58_vm0, %v4528_v32, 0.0 }
 0x745   :  { %1594 = vadd.xlane.f32.xlu1 %v1593_v37 }
 0x746   :  { %v1596_v38 = vsel %vm58_vm0, %v4531_v35, 0.0 }
 0x747   :  { %1597 = vadd.xlane.f32.xlu0 %v1596_v38 }
 0x7d2   :  { %v1595_v39 = vpop.xlane.xlu1 %1594 }
 0x7d3   :  { %v1599_v45 = vmul.f32 0.03125, %v1595_v39 }
 0x7d4   :  { %v1598_v0 = vpop.xlane.xlu0 %1597 }
 0x7d5   :  { %v1601_v48 = vsub.f32 %v4528_v32, %v1599_v45  ;;  %v1600_v49 = vmul.f32 0.03125, %v1598_v0 }
 0x7d7   :  { %v1602_v40 = vsub.f32 %v4531_v35, %v1600_v49  ;;  %v1603_v1 = vmul.f32 %v1601_v48, %v1601_v48 }
 0x7d9   :  { %v1605_v50 = vsel %vm58_vm0, %v1603_v1, 0.0  ;;  %v1604_v42 = vmul.f32 %v1602_v40, %v1602_v40  ;;  %v4142_v1 = vld [vmem:[%s4927_s1 + $0x70] sm:$0xff]  }
 0x7da   :  { %1606 = vadd.xlane.f32.xlu0 %v1605_v50  ;;  %v4143_v50 = vld [vmem:[%s4927_s1 + $0x78] sm:$0xff]  }
 0x7db   :  { %v1608_v36 = vsel %vm58_vm0, %v1604_v42, 0.0 }
 0x7de   :  { %1609 = vadd.xlane.f32.xlu0 %v1608_v36 }
 0x867   :  { %v1607_v56 = vpop.xlane.xlu0 %1606 }
 0x868   :  { %v1611_v57 = vmul.f32 0.03125, %v1607_v56 }
 0x86a   :  { %v1613_v58 = vadd.f32 1e-05, %v1611_v57 }
 0x86b   :  { %v1610_v60 = vpop.xlane.xlu0 %1609 }
 0x86c   :  { %4194 = vrsqrt.f32 %v1613_v58  ;;  %v1612_v61 = vmul.f32 0.03125, %v1610_v60  ;;  %v3677_v58 = vld [vmem:[%s4928_s2 + $0x9] ss:$0 sm:$0xff] }
 0x86e   :  { %v1614_v62 = vadd.f32 1e-05, %v1612_v61 }
 0x870   :  { %4196 = vrsqrt.f32 %v1614_v62 }
 0x876   :  { %v4195_v63 = vpop.eup %4194 }
 0x877   :  { %v1617_v2 = vmul.f32 %v4195_v63, %v1601_v48 }
 0x879   :  { %v1623_v5 = vmul.f32 %v3661_v3, %v1617_v2  ;;  %v3678_v2 = vld [vmem:[%s4928_s2 + $0xc] ss:$0 sm:$0xff] }
 0x87a   :  { %v4197_v4 = vpop.eup %4196 }
 0x87b   :  { %v1618_v6 = vmul.f32 %v4197_v4, %v1602_v40  ;;  %v1629_v9 = vadd.f32 %v3662_v7, %v1623_v5 }
 0x87d   :  { %v1624_v8 = vmul.f32 %v3661_v3, %v1618_v6 }
 0x87f   :  { %v1630_v10 = vadd.f32 %v3662_v7, %v1624_v8 }
 0x881   :  { %v1631_v11 = vpack.c.bf16 %v1630_v10, %v1629_v9 }
 0x883   :  { %3933 = vmatmul.mubr.msk.bf16.vlgmr.msra.gmra.mrb[24].mxu0 %vm58_vm0, %v1631_v11 }
 0x884   :  { %3960 = vmatprep.mubr.msk.bf16.mxu0 %vm4239_vm1, %v4238_v15  ;;  %3957 = vmatpush3.bf16.msra.mxu0 %v4142_v1 }
 0x885   :  { %3958 = vmatprep.subr.bf16.mxu0 %v4238_v15 }
 0x888   :  { %3959 = vmatpush3.bf16.msra.mxu0 %v4143_v50 }
 0x889   :  { %3964 = vmatprep.subr.mxu0 %v4238_v15 }
 0x956   :  { %v1685_v16 = vpop.f32.mrb[24].mxu0 }
 0x957   :  { %v1686_v17 = vadd.f32 %v3663_v14, %v1685_v16  ;;  %v3934_v18 = vpop.f32.mrb[25].mxu0 }
 0x958   :  { %v1688_v19 = vpop.f32.mrb[26].mxu0 }
 0x959   :  { %v1689_v20 = vadd.f32 %v3663_v14, %v1688_v19  ;;  %v3935_v21 = vpop.f32.mrb[27].mxu0  ;;  %v1692_v22 = vmax.f32 %v1686_v17, 0.0 }
 0x95b   :  { %v1693_v23 = vmax.f32 %v1689_v20, 0.0 }
 0x95d   :  { %v1694_v24 = vpack.c.bf16 %v1693_v23, %v1692_v22 }
 0x95f   :  { %3953 = vmatmul.mubr.bf16.vlgmr.msra.gmra.mrb[20].mxu1 %v1694_v24 }
 0x960   :  { %3996 = vmatprep.mubr.msk.f32.mxu1 %vm4239_vm1, %v4238_v15 }
 0xa32   :  { %v1777_v26 = vpop.f32.mrb[20].mxu1 }
 0xa33   :  { %v1784_v27 = vadd.f32 %v1777_v26, %v4528_v32  ;;  %v3954_v28 = vpop.f32.mrb[21].mxu1 }
 0xa34   :  { %v1780_v29 = vpop.f32.mrb[22].mxu1 }
 0xa35   :  { %v4599_v43 = vadd.f32 %v3675_v25, %v1784_v27  ;;  %v1785_v47 = vadd.f32 %v1780_v29, %v4531_v35  ;;  %v3955_v30 = vpop.f32.mrb[23].mxu1 }
 0xa37   :  { %v4602_v31 = vadd.f32 %v3675_v25, %v1785_v47  ;;  %v1828_v33 = vsel %vm58_vm0, %v4599_v43, 0.0 }
 0xa38   :  { %1829 = vadd.xlane.f32.xlu1 %v1828_v33 }
 0xa39   :  { %v1831_v34 = vsel %vm58_vm0, %v4602_v31, 0.0 }
 0xa3a   :  { %1832 = vadd.xlane.f32.xlu0 %v1831_v34 }
 0xac5   :  { %v1830_v37 = vpop.xlane.xlu1 %1829 }
 0xac6   :  { %v1834_v38 = vmul.f32 0.03125, %v1830_v37 }
 0xac7   :  { %v1833_v32 = vpop.xlane.xlu0 %1832 }
 0xac8   :  { %v1836_v39 = vsub.f32 %v4599_v43, %v1834_v38  ;;  %v1835_v45 = vmul.f32 0.03125, %v1833_v32 }
 0xaca   :  { %v1837_v0 = vsub.f32 %v4602_v31, %v1835_v45  ;;  %v1838_v35 = vmul.f32 %v1836_v39, %v1836_v39 }
 0xacc   :  { %v1840_v48 = vsel %vm58_vm0, %v1838_v35, 0.0  ;;  %v1839_v49 = vmul.f32 %v1837_v0, %v1837_v0 }
 0xacd   :  { %1841 = vadd.xlane.f32.xlu1 %v1840_v48 }
 0xace   :  { %v1843_v40 = vsel %vm58_vm0, %v1839_v49, 0.0 }
 0xacf   :  { %1844 = vadd.xlane.f32.xlu0 %v1843_v40 }
 0xb5a   :  { %v1842_v42 = vpop.xlane.xlu1 %1841 }
 0xb5b   :  { %v1846_v36 = vmul.f32 0.03125, %v1842_v42 }
 0xb5c   :  { %v1845_v44 = vpop.xlane.xlu0 %1844 }
 0xb5d   :  { %v1848_v41 = vadd.f32 1e-05, %v1846_v36  ;;  %v1847_v46 = vmul.f32 0.03125, %v1845_v44 }
 0xb5f   :  { %4198 = vrsqrt.f32 %v1848_v41  ;;  %v1849_v51 = vadd.f32 1e-05, %v1847_v46 }
 0xb61   :  { %4200 = vrsqrt.f32 %v1849_v51 }
 0xb69   :  { %v4199_v52 = vpop.eup %4198 }
 0xb6a   :  { %v1852_v54 = vmul.f32 %v4199_v52, %v1836_v39 }
 0xb6b   :  { %v4201_v55 = vpop.eup %4200 }
 0xb6c   :  { %v1858_v56 = vmul.f32 %v3676_v53, %v1852_v54  ;;  %v1853_v57 = vmul.f32 %v4201_v55, %v1837_v0 }
 0xb6e   :  { %v1859_v60 = vmul.f32 %v3676_v53, %v1853_v57  ;;  %v1864_v61 = vadd.f32 %v3677_v58, %v1858_v56 }
 0xb70   :  { %v1865_v62 = vadd.f32 %v3677_v58, %v1859_v60 }
 0xb72   :  { %v1866_v63 = vpack.c.bf16 %v1865_v62, %v1864_v61 }
 0xb74   :  { %3961 = vmatmul.mubr.msk.bf16.vlgmr.msra.gmra.mrb[28].mxu0 %vm58_vm0, %v1866_v63 }
 0xb75   :  { %3966 = vmatprep.mubr.msk.f32.mxu0 %vm4239_vm1, %v4238_v15 }
 0xc47   :  { %v1920_v3 = vpop.f32.mrb[28].mxu0 }
 0xc48   :  { %v4632_v4 = vadd.f32 %v3678_v2, %v1920_v3  ;;  %v3962_v5 = vpop.f32.mrb[29].mxu0 }
 0xc49   :  { %v1923_v6 = vpop.f32.mrb[30].mxu0 }
 0xc4a   :  { %v4634_v7 = vadd.f32 %v3678_v2, %v1923_v6  ;;  %1929 = vrot.lane.b32.xlu1 %v4632_v4, %s4241_s26  ;;  %v3963_v8 = vpop.f32.mrb[31].mxu0 }
 0xc4c   :  { %1931 = vrot.lane.b32.xlu0 %v4634_v7, %s4241_s26 }
 0xc4e   :  { %1933 = vrot.lane.b32.xlu1 %v4632_v4, %s4240_s25 }
 0xc50   :  { %1939 = vrot.lane.b32.xlu0 %v4634_v7, %s4242_s27 }
 0xc52   :  { %1935 = vrot.lane.b32.xlu1 %v4634_v7, %s4240_s25 }
 0xc54   :  { %2017 = vrot.lane.b32.xlu0 %v4634_v7, %s4243_s28 }
 0xc56   :  { %1937 = vrot.lane.b32.xlu1 %v4632_v4, %s4242_s27 }
 0xc5a   :  { %1941 = vrot.lane.b32.xlu1 %v4632_v4, %s4243_s28 }
 0xcbc   :  { %v4652_v9 = vpop.permute.xlu1 %1929 }
 0xcbd   :  { %2093 = vrot.lane.b32.xlu1 %v4652_v9, %s4243_s28 }
 0xcbe   :  { %v4656_v10 = vpop.permute.xlu0 %1931 }
 0xcbf   :  { %2169 = vrot.lane.b32.xlu0 %v4656_v10, %s4243_s28 }
 0xcc0   :  { %v4660_v11 = vpop.permute.xlu1 %1933 }
 0xcc1   :  { %2245 = vrot.lane.b32.xlu1 %v4660_v11, %s4243_s28 }
 0xcc2   :  { %v4668_v13 = vpop.permute.xlu0 %1939 }
 0xcc4   :  { %v4664_v12 = vpop.permute.xlu1 %1935 }
 0xcc5   :  { %2321 = vrot.lane.b32.xlu0 %v4664_v12, %s4243_s28 }
 0xcc6   :  { %v2018_v17 = vpop.permute.xlu0 %2017 }
 0xcc8   :  { %v4670_v14 = vpop.permute.xlu1 %1937 }
 0xcc9   :  { %2397 = vrot.lane.b32.xlu1 %v4670_v14, %s4243_s28  ;;  %2473 = vrot.lane.b32.xlu0 %v4668_v13, %s4243_s28 }
 0xccc   :  { %v1942_v16 = vpop.permute.xlu1 %1941 }
 0xccd   :  { %3965 = vmatpush3.xpose.msk.msra.mxu0 %vm175_vm2, %v1942_v16 }
 0xcce   :  { %3969 = vmatprep.subr.mxu0 %v4238_v15 }
 0xcd0   :  { %3967 = vmatmul.mubr.msk.f32.vlgmr.msra.gmra.mrb[18].mxu0 %vm175_vm2, %v4632_v4 }
 0xcd1   :  { %3970 = vmatpush3.xpose.msk.msra.mxu0 %vm175_vm2, %v2018_v17  ;;  %3971 = vmatprep.mubr.msk.f32.mxu0 %vm4239_vm1, %v4238_v15 }
 0xcd2   :  { %3974 = vmatprep.subr.mxu0 %v4238_v15 }
 0xcd4   :  { %3972 = vmatmul.mubr.msk.f32.vlgmr.msra.gmra.mrb[32].mxu0 %vm175_vm2, %v4634_v7 }
 0xcd5   :  { %3976 = vmatprep.mubr.msk.f32.mxu0 %vm4239_vm1, %v4238_v15 }
 0xd2f   :  { %v2094_v18 = vpop.permute.xlu1 %2093 }
 0xd30   :  { %3975 = vmatpush3.xpose.msk.msra.mxu0 %vm175_vm2, %v2094_v18 }
 0xd31   :  { %3979 = vmatprep.subr.mxu0 %v4238_v15  ;;  %v2170_v19 = vpop.permute.xlu0 %2169 }
 0xd33   :  { %3977 = vmatmul.mubr.msk.f32.vlgmr.msra.gmra.mrb[34].mxu0 %vm175_vm2, %v4652_v9  ;;  %v2246_v20 = vpop.permute.xlu1 %2245 }
 0xd34   :  { %3980 = vmatpush3.xpose.msk.msra.mxu0 %vm175_vm2, %v2170_v19  ;;  %3981 = vmatprep.mubr.msk.f32.mxu0 %vm4239_vm1, %v4238_v15 }
 0xd35   :  { %3984 = vmatprep.subr.mxu0 %v4238_v15 }
 0xd37   :  { %3982 = vmatmul.mubr.msk.f32.vlgmr.msra.gmra.mrb[36].mxu0 %vm175_vm2, %v4656_v10  ;;  %v2322_v21 = vpop.permute.xlu0 %2321 }
 0xd38   :  { %3985 = vmatpush3.xpose.msk.msra.mxu0 %vm175_vm2, %v2246_v20  ;;  %3986 = vmatprep.mubr.msk.f32.mxu0 %vm4239_vm1, %v4238_v15 }
 0xd39   :  { %3989 = vmatprep.subr.mxu0 %v4238_v15 }
 0xd3b   :  { %v2398_v22 = vpop.permute.xlu1 %2397  ;;  %3987 = vmatmul.mubr.msk.f32.vlgmr.msra.gmra.mrb[38].mxu0 %vm175_vm2, %v4660_v11  ;;  %v2474_v23 = vpop.permute.xlu0 %2473 }
 0xd3c   :  { %3990 = vmatpush3.xpose.msk.msra.mxu0 %vm175_vm2, %v2322_v21  ;;  %3995 = vmatpush3.xpose.msk.msra.mxu1 %vm175_vm2, %v2398_v22 }
 0xd3d   :  { %3991 = vmatprep.mubr.msk.f32.mxu0 %vm4239_vm1, %v4238_v15  ;;  %3999 = vmatprep.subr.mxu0 %v4238_v15 }
 0xd3e   :  { %4004 = vmatprep.subr.mxu1 %v4238_v15 }
 0xd3f   :  { %3992 = vmatmul.mubr.msk.f32.vlgmr.msra.gmra.mrb[40].mxu0 %vm175_vm2, %v4664_v12  ;;  %3997 = vmatmul.mubr.msk.f32.vlgmr.msra.gmra.mrb[18].mxu1 %vm175_vm2, %v4670_v14 }
 0xd40   :  { %4000 = vmatpush3.xpose.msk.msra.mxu0 %vm175_vm2, %v2474_v23  ;;  %4001 = vmatprep.mubr.msk.f32.mxu0 %vm4239_vm1, %v4238_v15 }
 0xd41   :  { %4009 = vmatprep.subr.mxu0 %v4238_v15  ;;  %4006 = vmatprep.mubr.msk.f32.mxu1 %vm4239_vm1, %v4238_v15 }
 0xd43   :  { %4002 = vmatmul.mubr.msk.f32.vlgmr.msra.gmra.mrb[42].mxu0 %vm175_vm2, %v4668_v13 }
 0xd44   :  { %4011 = vmatprep.mubr.msk.f32.mxu0 %vm4239_vm1, %v4238_v15 }
 0xda3   :  { %v2013_v24 = vpop.f32.mrb[18].mxu0 }
 0xda4   :  { %v2549_v25 = vmul.f32 0.35355338, %v2013_v24  ;;  %v3968_v26 = vpop.f32.mrb[19].mxu0 }
 0xda6   :  { %v2557_v27 = vsel %vm4404_vm3, -1e+30, %v2549_v25 }
 0xda7   :  { %v2089_v28 = vpop.f32.mrb[32].mxu0  ;;  %v2565_v29 = vsel %vm175_vm2, %v2557_v27, -inf }
 0xda8   :  { %v2550_v47 = vmul.f32 0.35355338, %v2089_v28  ;;  %2566 = vmax.xlane.f32.xlu1 %v2565_v29  ;;  %v3973_v30 = vpop.f32.mrb[33].mxu0 }
 0xdaa   :  { %v2558_v33 = vsel %vm4404_vm3, -1e+30, %v2550_v47 }
 0xdab   :  { %v2568_v34 = vsel %vm175_vm2, %v2558_v33, -inf }
 0xdac   :  { %2569 = vmax.xlane.f32.xlu0 %v2568_v34 }
 0xe06   :  { %v2165_v37 = vpop.f32.mrb[34].mxu0 }
 0xe07   :  { %v2551_v38 = vmul.f32 0.35355338, %v2165_v37  ;;  %v3978_v32 = vpop.f32.mrb[35].mxu0 }
 0xe09   :  { %v2559_v39 = vsel %vm4404_vm3, -1e+30, %v2551_v38 }
 0xe0a   :  { %v2241_v45 = vpop.f32.mrb[36].mxu0  ;;  %v2571_v0 = vsel %vm175_vm2, %v2559_v39, -inf }
 0xe0b   :  { %v2552_v35 = vmul.f32 0.35355338, %v2241_v45  ;;  %2572 = vmax.xlane.f32.xlu0 %v2571_v0  ;;  %v3983_v48 = vpop.f32.mrb[37].mxu0 }
 0xe0d   :  { %v2560_v49 = vsel %vm4404_vm3, -1e+30, %v2552_v35 }
 0xe0e   :  { %v2317_v40 = vpop.f32.mrb[38].mxu0  ;;  %v2574_v1 = vsel %vm175_vm2, %v2560_v49, -inf }
 0xe0f   :  { %v2553_v50 = vmul.f32 0.35355338, %v2317_v40  ;;  %2575 = vmax.xlane.f32.xlu0 %v2574_v1  ;;  %v3988_v42 = vpop.f32.mrb[39].mxu0 }
 0xe11   :  { %v2561_v36 = vsel %vm4404_vm3, -1e+30, %v2553_v50 }
 0xe12   :  { %v2393_v44 = vpop.f32.mrb[40].mxu0  ;;  %v2469_v41 = vpop.f32.mrb[18].mxu1  ;;  %v2577_v46 = vsel %vm175_vm2, %v2561_v36, -inf }
 0xe13   :  { %v2554_v51 = vmul.f32 0.35355338, %v2393_v44  ;;  %v2555_v52 = vmul.f32 0.35355338, %v2469_v41  ;;  %v3998_v53 = vpop.f32.mrb[19].mxu1  ;;  %2578 = vmax.xlane.f32.xlu1 %v2577_v46  ;;  %v3993_v54 = vpop.f32.mrb[41].mxu0 }
 0xe15   :  { %v2563_v55 = vsel %vm4404_vm3, -1e+30, %v2555_v52  ;;  %v2562_v56 = vsel %vm4404_vm3, -1e+30, %v2554_v51 }
 0xe16   :  { %v2545_v57 = vpop.f32.mrb[42].mxu0  ;;  %v2583_v58 = vsel %vm175_vm2, %v2563_v55, -inf  ;;  %v2580_v60 = vsel %vm175_vm2, %v2562_v56, -inf }
 0xe17   :  { %v2556_v61 = vmul.f32 0.35355338, %v2545_v57  ;;  %2584 = vmax.xlane.f32.xlu1 %v2583_v58  ;;  %2581 = vmax.xlane.f32.xlu0 %v2580_v60  ;;  %v4003_v62 = vpop.f32.mrb[43].mxu0 }
 0xe19   :  { %v2564_v63 = vsel %vm4404_vm3, -1e+30, %v2556_v61 }
 0xe1a   :  { %v2586_v2 = vsel %vm175_vm2, %v2564_v63, -inf }
 0xe1b   :  { %2587 = vmax.xlane.f32.xlu0 %v2586_v2 }
 0xe28   :  { %2653 = vrot.lane.b32.xlu1 %v4632_v4, %s4244_s29 }
 0xe2c   :  { %2805 = vrot.lane.b32.xlu1 %v4652_v9, %s4244_s29 }
 0xe30   :  { %2881 = vrot.lane.b32.xlu1 %v4656_v10, %s4244_s29 }
 0xe31   :  { %2729 = vrot.lane.b32.xlu0 %v4634_v7, %s4244_s29 }
 0xe34   :  { %2957 = vrot.lane.b32.xlu1 %v4660_v11, %s4244_s29 }
 0xe35   :  { %3033 = vrot.lane.b32.xlu0 %v4664_v12, %s4244_s29  ;;  %v2567_v5 = vpop.xlane.xlu1 %2566 }
 0xe36   :  { %v2589_v6 = vsub.f32 %v2557_v27, %v2567_v5 }
 0xe38   :  { %v2597_v8 = vmul.f32 1.442695, %v2589_v6 }
 0xe39   :  { %v2570_v59 = vpop.xlane.xlu0 %2569 }
 0xe3a   :  { %v2590_v3 = vsub.f32 %v2558_v33, %v2570_v59 }
 0xe3c   :  { %v2599_v4 = vmul.f32 1.442695, %v2590_v3 }
 0xe3e   :  { %4202 = vpow2.f32 %v2599_v4 }
 0xe3f   :  { %4204 = vpow2.f32 %v2597_v8 }
 0xe48   :  { %v4760_v9 = vpop.eup %4202 }
 0xe49   :  { %v2616_v10 = vsel %vm175_vm2, %v4760_v9, 0.0  ;;  %v4764_v7 = vpop.eup %4204 }
 0xe4a   :  { %v2613_v11 = vsel %vm175_vm2, %v4764_v7, 0.0 }
 0xe54   :  { %2617 = vadd.xlane.f32.xlu0 %v2616_v10 }
 0xe58   :  { %2614 = vadd.xlane.f32.xlu1 %v2613_v11 }
 0xe98   :  { %v2573_v12 = vpop.xlane.xlu0 %2572 }
 0xe99   :  { %v2591_v16 = vsub.f32 %v2559_v39, %v2573_v12 }
 0xe9b   :  { %v2601_v17 = vmul.f32 1.442695, %v2591_v16 }
 0xe9c   :  { %v2576_v18 = vpop.xlane.xlu0 %2575 }
 0xe9d   :  { %4206 = vpow2.f32 %v2601_v17  ;;  %v2592_v19 = vsub.f32 %v2560_v49, %v2576_v18 }
 0xe9f   :  { %v2603_v20 = vmul.f32 1.442695, %v2592_v19 }
 0xea0   :  { %v2579_v21 = vpop.xlane.xlu1 %2578 }
 0xea1   :  { %4208 = vpow2.f32 %v2603_v20  ;;  %v2593_v22 = vsub.f32 %v2561_v36, %v2579_v21 }
 0xea3   :  { %v2605_v28 = vmul.f32 1.442695, %v2593_v22 }
 0xea4   :  { %v2585_v23 = vpop.xlane.xlu1 %2584  ;;  %v2582_v24 = vpop.xlane.xlu0 %2581 }
 0xea5   :  { %v2595_v25 = vsub.f32 %v2563_v55, %v2585_v23  ;;  %v2594_v26 = vsub.f32 %v2562_v56, %v2582_v24 }
 0xea7   :  { %v4207_v27 = vpop.eup %4206  ;;  %v2609_v29 = vmul.f32 1.442695, %v2595_v25  ;;  %v2607_v47 = vmul.f32 1.442695, %v2594_v26  ;;  %v4144_v25 = vld [vmem:[%s4927_s1 + $0x80] sm:$0xff]   ;;  %v4145_v26 = vld [vmem:[%s4927_s1 + $0x88] sm:$0xff]  }
 0xea8   :  { %v2654_v30 = vpop.permute.xlu1 %2653  ;;  %v2588_v33 = vpop.xlane.xlu0 %2587  ;;  %v2619_v34 = vsel %vm175_vm2, %v4207_v27, 0.0 }
 0xea9   :  { %4210 = vpow2.f32 %v2609_v29  ;;  %v2596_v37 = vsub.f32 %v2564_v63, %v2588_v33  ;;  %2620 = vadd.xlane.f32.xlu1 %v2619_v34  ;;  %4005 = vmatpush3.msra.mxu1 %v2654_v30 }
 0xeaa   :  { %4212 = vpow2.f32 %v2607_v47  ;;  %4014 = vmatprep.subr.mxu1 %v4238_v15 }
 0xeab   :  { %v4209_v38 = vpop.eup %4208  ;;  %4214 = vpow2.f32 %v2605_v28  ;;  %v2611_v32 = vmul.f32 1.442695, %v2596_v37 }
 0xeac   :  { %v2730_v39 = vpop.permute.xlu0 %2729  ;;  %v2622_v45 = vsel %vm175_vm2, %v4209_v38, 0.0  ;;  %v2806_v36 = vpop.permute.xlu1 %2805 }
 0xead   :  { %4216 = vpow2.f32 %v2611_v32  ;;  %2623 = vadd.xlane.f32.xlu0 %v2622_v45  ;;  %4010 = vmatpush3.msra.mxu0 %v2730_v39 }
 0xeae   :  { %4019 = vmatprep.subr.mxu0 %v4238_v15 }
 0xeb0   :  { %v2882_v44 = vpop.permute.xlu1 %2881  ;;  %v3034_v41 = vpop.permute.xlu0 %3033 }
 0xeb3   :  { %v4772_v0 = vpop.eup %4210 }
 0xeb4   :  { %v4213_v35 = vpop.eup %4212  ;;  %v2631_v48 = vsel %vm175_vm2, %v4772_v0, 0.0  ;;  %v2958_v46 = vpop.permute.xlu1 %2957 }
 0xeb5   :  { %v4215_v49 = vpop.eup %4214  ;;  %2632 = vadd.xlane.f32.xlu1 %v2631_v48  ;;  %v2628_v40 = vsel %vm175_vm2, %v4213_v35, 0.0 }
 0xeb6   :  { %2629 = vadd.xlane.f32.xlu0 %v2628_v40  ;;  %v2625_v50 = vsel %vm175_vm2, %v4215_v49, 0.0 }
 0xeb7   :  { %v4217_v1 = vpop.eup %4216 }
 0xeb8   :  { %v2634_v42 = vsel %vm175_vm2, %v4217_v1, 0.0 }
 0xeb9   :  { %2626 = vadd.xlane.f32.xlu1 %v2625_v50 }
 0xeba   :  { %2635 = vadd.xlane.f32.xlu0 %v2634_v42 }
 0xeca   :  { %3109 = vrot.lane.b32.xlu1 %v4670_v14, %s4244_s29 }
 0xed0   :  { %3185 = vrot.lane.b32.xlu0 %v4668_v13, %s4244_s29 }
 0xee1   :  { %v2618_v51 = vpop.xlane.xlu0 %2617 }
 0xee2   :  { %4218 = vrcp.f32 %v2618_v51 }
 0xee5   :  { %v2615_v52 = vpop.xlane.xlu1 %2614 }
 0xee6   :  { %4220 = vrcp.f32 %v2615_v52 }
 0xeec   :  { %v4219_v53 = vpop.eup %4218 }
 0xeed   :  { %v2646_v54 = vmul.f32 %v4219_v53, %v4760_v9  ;;  %v3709_v53 = vld [vmem:[%s4928_s2 + $0xd] ss:$0 sm:$0xff] }
 0xeef   :  { %4012 = vmatmul.mubr.msk.f32.vlgmr.msra.gmra.mrb[44].mxu0 %vm175_vm2, %v2646_v54 }
 0xef0   :  { %v4221_v55 = vpop.eup %4220  ;;  %4020 = vmatpush3.msra.mxu0 %v2882_v44  ;;  %4021 = vmatprep.mubr.msk.f32.mxu0 %vm4239_vm1, %v4238_v15 }
 0xef1   :  { %v2645_v13 = vmul.f32 %v4221_v55, %v4764_v7  ;;  %4029 = vmatprep.subr.mxu0 %v4238_v15 }
 0xef3   :  { %4007 = vmatmul.mubr.msk.f32.vlgmr.msra.gmra.mrb[24].mxu1 %vm175_vm2, %v2645_v13 }
 0xef4   :  { %4015 = vmatpush3.msra.mxu1 %v2806_v36  ;;  %4016 = vmatprep.mubr.msk.f32.mxu1 %vm4239_vm1, %v4238_v15 }
 0xef5   :  { %4024 = vmatprep.subr.mxu1 %v4238_v15 }
 0xf36   :  { %v2621_v14 = vpop.xlane.xlu1 %2620 }
 0xf37   :  { %4222 = vrcp.f32 %v2621_v14 }
 0xf3a   :  { %v2624_v56 = vpop.xlane.xlu0 %2623 }
 0xf3b   :  { %4224 = vrcp.f32 %v2624_v56 }
 0xf41   :  { %v4223_v57 = vpop.eup %4222 }
 0xf42   :  { %v2647_v58 = vmul.f32 %v4223_v57, %v4207_v27  ;;  %v2633_v60 = vpop.xlane.xlu1 %2632 }
 0xf43   :  { %v2630_v61 = vpop.xlane.xlu0 %2629 }
 0xf44   :  { %4226 = vrcp.f32 %v2630_v61  ;;  %4017 = vmatmul.mubr.msk.f32.vlgmr.msra.gmra.mrb[26].mxu1 %vm175_vm2, %v2647_v58 }
 0xf45   :  { %v4225_v62 = vpop.eup %4224  ;;  %4025 = vmatpush3.msra.mxu1 %v2958_v46  ;;  %4026 = vmatprep.mubr.msk.f32.mxu1 %vm4239_vm1, %v4238_v15 }
 0xf46   :  { %v2648_v63 = vmul.f32 %v4225_v62, %v4209_v38  ;;  %v2627_v2 = vpop.xlane.xlu1 %2626  ;;  %4034 = vmatprep.subr.mxu1 %v4238_v15 }
 0xf47   :  { %4228 = vrcp.f32 %v2627_v2  ;;  %v2636_v59 = vpop.xlane.xlu0 %2635 }
 0xf48   :  { %4230 = vrcp.f32 %v2636_v59  ;;  %4022 = vmatmul.mubr.msk.f32.vlgmr.msra.gmra.mrb[46].mxu0 %vm175_vm2, %v2648_v63 }
 0xf49   :  { %4232 = vrcp.f32 %v2633_v60  ;;  %4030 = vmatpush3.msra.mxu0 %v3034_v41  ;;  %4031 = vmatprep.mubr.msk.f32.mxu0 %vm4239_vm1, %v4238_v15 }
 0xf4a   :  { %4039 = vmatprep.subr.mxu0 %v4238_v15  ;;  %v3110_v11 = vpop.permute.xlu1 %3109 }
 0xf4b   :  { %v3186_v4 = vpop.permute.xlu0 %3185 }
 0xf4e   :  { %v4227_v3 = vpop.eup %4226 }
 0xf4f   :  { %v2650_v5 = vmul.f32 %v4227_v3, %v4213_v35 }
 0xf51   :  { %v4229_v6 = vpop.eup %4228  ;;  %4032 = vmatmul.mubr.msk.f32.vlgmr.msra.gmra.mrb[48].mxu0 %vm175_vm2, %v2650_v5 }
 0xf52   :  { %v4231_v8 = vpop.eup %4230  ;;  %v2649_v9 = vmul.f32 %v4229_v6, %v4215_v49  ;;  %4040 = vmatpush3.msra.mxu0 %v3186_v4  ;;  %4041 = vmatprep.mubr.msk.f32.mxu0 %vm4239_vm1, %v4238_v15 }
 0xf53   :  { %v4233_v10 = vpop.eup %4232  ;;  %v2652_v7 = vmul.f32 %v4231_v8, %v4217_v1  ;;  %4052 = vmatprep.subr.bf16.mxu0 %v4238_v15 }
 0xf54   :  { %4027 = vmatmul.mubr.msk.f32.vlgmr.msra.gmra.mrb[28].mxu1 %vm175_vm2, %v2649_v9  ;;  %v2651_v12 = vmul.f32 %v4233_v10, %v4772_v0  ;;  %v4146_v9 = vld [vmem:[%s4927_s1 + $0x90] sm:$0xff]   ;;  %v4147_v10 = vld [vmem:[%s4927_s1 + $0x98] sm:$0xff]  }
 0xf55   :  { %4035 = vmatpush3.msra.mxu1 %v3110_v11  ;;  %4042 = vmatmul.mubr.msk.f32.vlgmr.msra.gmra.mrb[50].mxu0 %vm175_vm2, %v2652_v7  ;;  %v4148_v7 = vld [vmem:[%s4927_s1 + $0xa0] sm:$0xff]   ;;  %v4149_v11 = vld [vmem:[%s4927_s1 + $0xa8] sm:$0xff]  }
 0xf56   :  { %4036 = vmatprep.mubr.msk.f32.mxu1 %vm4239_vm1, %v4238_v15  ;;  %4044 = vmatprep.subr.bf16.mxu1 %v4238_v15 }
 0xf57   :  { %4056 = vmatprep.mubr.msk.bf16.mxu0 %vm4239_vm1, %v4238_v15  ;;  %4053 = vmatpush3.bf16.msra.mxu0 %v4146_v9 }
 0xf58   :  { %4037 = vmatmul.mubr.msk.f32.vlgmr.msra.gmra.mrb[30].mxu1 %vm175_vm2, %v2651_v12  ;;  %4054 = vmatprep.subr.bf16.mxu0 %v4238_v15  ;;  %v4150_v12 = vld [vmem:[%s4927_s1 + $0xb0] sm:$0xff]  }
 0xf59   :  { %4048 = vmatprep.mubr.msk.bf16.mxu1 %vm4239_vm1, %v4238_v15  ;;  %4045 = vmatpush3.bf16.msra.mxu1 %v4144_v25 }
 0xf5a   :  { %4046 = vmatprep.subr.bf16.mxu1 %v4238_v15 }
 0xf5b   :  { %4055 = vmatpush3.bf16.msra.mxu0 %v4147_v10 }
 0xf5c   :  { %4080 = vmatprep.subr.bf16.mxu0 %v4238_v15 }
 0xf5d   :  { %4047 = vmatpush3.bf16.msra.mxu1 %v4145_v26 }
 0xf5e   :  { %4060 = vmatprep.subr.bf16.mxu1 %v4238_v15 }
 0xfc2   :  { %v2801_v16 = vpop.f32.mrb[44].mxu0 }
 0xfc3   :  { %v4013_v17 = vpop.f32.mrb[45].mxu0 }
 0xfc4   :  { %v4152_v17 = vld [vmem:[%s4927_s1 + $0xc0] sm:$0xff]  }
 0xfc6   :  { %v2725_v18 = vpop.f32.mrb[24].mxu1 }
 0xfc7   :  { %v4008_v19 = vpop.f32.mrb[25].mxu1 }
0x1017   :  { %v2877_v20 = vpop.f32.mrb[26].mxu1 }
0x1018   :  { %v4018_v21 = vpop.f32.mrb[27].mxu1 }
0x101b   :  { %v2953_v22 = vpop.f32.mrb[46].mxu0 }
0x101c   :  { %v4113_v23 = vpack.i.bf16 %v2953_v22, %v2877_v20  ;;  %v4023_v24 = vpop.f32.mrb[47].mxu0 }
0x101e   :  { %4114 = vrot.lane.b32.xlu1 %v4113_v23, %s4245_s7 }
0x1024   :  { %v3105_v27 = vpop.f32.mrb[48].mxu0 }
0x1025   :  { %v4033_v28 = vpop.f32.mrb[49].mxu0 }
0x1027   :  { %v3029_v29 = vpop.f32.mrb[28].mxu1 }
0x1028   :  { %v4118_v47 = vpack.i.bf16 %v3105_v27, %v3029_v29  ;;  %v3257_v30 = vpop.f32.mrb[50].mxu0  ;;  %v4028_v33 = vpop.f32.mrb[29].mxu1  ;;  %v3710_v27 = vld [vmem:[%s4928_s2 + $0xa] ss:$0 sm:$0xff] }
0x1029   :  { %v4043_v34 = vpop.f32.mrb[51].mxu0 }
0x102a   :  { %4119 = vrot.lane.b32.xlu0 %v4118_v47, %s4246_s8 }
0x102b   :  { %v3181_v37 = vpop.f32.mrb[30].mxu1 }
0x102c   :  { %v4123_v38 = vpack.i.bf16 %v3257_v30, %v3181_v37  ;;  %v4038_v32 = vpop.f32.mrb[31].mxu1  ;;  %v3711_v30 = vld [vmem:[%s4928_s2 + $0xb] ss:$0 sm:$0xff] }
0x102d   :  { %v4154_v32 = vld [vmem:[%s4927_s1 + $0xd0] sm:$0xff]  }
0x102e   :  { %4124 = vrot.lane.b32.xlu1 %v4123_v38, %s4247_s9 }
0x1090   :  { %v4115_v39 = vpop.permute.xlu1 %4114 }
0x1091   :  { %v4117_v0 = vunpack.i.h.bf16 %v4115_v39  ;;  %v4116_v35 = vunpack.i.l.bf16 %v4115_v39  ;;  %v4155_v39 = vld [vmem:[%s4927_s1 + $0xd8] sm:$0xff]  }
0x1093   :  { %v3286_v1 = vsel %vm175_vm2, %v2801_v16, %v4117_v0  ;;  %v3285_v50 = vsel %vm175_vm2, %v2725_v18, %v4116_v35  ;;  %v4151_v16 = vld [vmem:[%s4927_s1 + $0xb8] sm:$0xff]   ;;  %v4153_v18 = vld [vmem:[%s4927_s1 + $0xc8] sm:$0xff]  }
0x109c   :  { %v4120_v45 = vpop.permute.xlu0 %4119 }
0x109d   :  { %v4122_v48 = vunpack.i.h.bf16 %v4120_v45  ;;  %v4121_v49 = vunpack.i.l.bf16 %v4120_v45  ;;  %v3712_v45 = vld [vmem:[%s4928_s2 + $0xe] ss:$0 sm:$0xff] }
0x109f   :  { %v3288_v44 = vsel %vm1522_vm4, %v3286_v1, %v4122_v48  ;;  %v3287_v41 = vsel %vm1522_vm4, %v3285_v50, %v4121_v49 }
0x10a0   :  { %v4125_v40 = vpop.permute.xlu1 %4124 }
0x10a1   :  { %v4127_v42 = vunpack.i.h.bf16 %v4125_v40  ;;  %v4126_v36 = vunpack.i.l.bf16 %v4125_v40 }
0x10a3   :  { %v3290_v46 = vsel %vm1525_vm5, %v3288_v44, %v4127_v42  ;;  %v3289_v51 = vsel %vm1525_vm5, %v3287_v41, %v4126_v36  ;;  %v4156_v44 = vld [vmem:[%s4927_s1 + $0xe0] sm:$0xff]   ;;  %v4157_v41 = vld [vmem:[%s4927_s1 + $0xe8] sm:$0xff]  }
0x10a4   :  { %v3291_v52 = vpack.c.bf16 %v3290_v46, %v3289_v51 }
0x10a6   :  { %4049 = vmatmul.mubr.msk.bf16.vlgmr.msra.gmra.mrb[32].mxu1 %vm58_vm0, %v3291_v52 }
0x10a7   :  { %4076 = vmatprep.mubr.msk.bf16.mxu1 %vm4239_vm1, %v4238_v15  ;;  %4061 = vmatpush3.bf16.msra.mxu1 %v4148_v7 }
0x10a8   :  { %4062 = vmatprep.subr.bf16.mxu1 %v4238_v15 }
0x10ab   :  { %4063 = vmatpush3.bf16.msra.mxu1 %v4149_v11 }
0x10ac   :  { %4064 = vmatprep.subr.bf16.mxu1 %v4238_v15 }
0x10af   :  { %4065 = vmatpush3.bf16.msra.mxu1 %v4150_v12 }
0x10b0   :  { %4066 = vmatprep.subr.bf16.mxu1 %v4238_v15 }
0x10b3   :  { %4067 = vmatpush3.bf16.msra.mxu1 %v4151_v16 }
0x10b4   :  { %4068 = vmatprep.subr.bf16.mxu1 %v4238_v15 }
0x10b7   :  { %4069 = vmatpush3.bf16.msra.mxu1 %v4152_v17 }
0x10b8   :  { %4070 = vmatprep.subr.bf16.mxu1 %v4238_v15 }
0x10bb   :  { %4071 = vmatpush3.bf16.msra.mxu1 %v4153_v18 }
0x10bc   :  { %4072 = vmatprep.subr.bf16.mxu1 %v4238_v15 }
0x10bf   :  { %4073 = vmatpush3.bf16.msra.mxu1 %v4154_v32 }
0x10c0   :  { %4074 = vmatprep.subr.bf16.mxu1 %v4238_v15 }
0x10c3   :  { %4075 = vmatpush3.bf16.msra.mxu1 %v4155_v39 }
0x1179   :  { %v3341_v54 = vpop.f32.mrb[32].mxu1 }
0x117a   :  { %v3348_v55 = vadd.f32 %v3341_v54, %v4599_v43  ;;  %v4050_v13 = vpop.f32.mrb[33].mxu1 }
0x117b   :  { %v3344_v14 = vpop.f32.mrb[34].mxu1 }
0x117c   :  { %v4840_v56 = vadd.f32 %v3709_v53, %v3348_v55  ;;  %v3349_v57 = vadd.f32 %v3344_v14, %v4602_v31  ;;  %v4051_v58 = vpop.f32.mrb[35].mxu1 }
0x117d   :  { %v3725_v58 = vld [vmem:[%s4928_s2 + $0x10] ss:$0 sm:$0xff] }
0x117e   :  { %v4843_v60 = vadd.f32 %v3709_v53, %v3349_v57  ;;  %v3356_v61 = vsel %vm58_vm0, %v4840_v56, 0.0  ;;  %v3724_v53 = vld [vmem:[%s4928_s2 + $0xf] ss:$0 sm:$0xff] }
0x117f   :  { %3357 = vadd.xlane.f32.xlu0 %v3356_v61 }
0x1180   :  { %v3359_v62 = vsel %vm58_vm0, %v4843_v60, 0.0 }
0x1181   :  { %3360 = vadd.xlane.f32.xlu1 %v3359_v62 }
0x120c   :  { %v3358_v63 = vpop.xlane.xlu0 %3357 }
0x120d   :  { %v3362_v2 = vmul.f32 0.03125, %v3358_v63 }
0x120e   :  { %v3361_v43 = vpop.xlane.xlu1 %3360 }
0x120f   :  { %v3364_v59 = vsub.f32 %v4840_v56, %v3362_v2  ;;  %v3363_v3 = vmul.f32 0.03125, %v3361_v43 }
0x1211   :  { %v3365_v5 = vsub.f32 %v4843_v60, %v3363_v3  ;;  %v3366_v31 = vmul.f32 %v3364_v59, %v3364_v59 }
0x1213   :  { %v3368_v6 = vsel %vm58_vm0, %v3366_v31, 0.0  ;;  %v3367_v4 = vmul.f32 %v3365_v5, %v3365_v5 }
0x1214   :  { %3369 = vadd.xlane.f32.xlu0 %v3368_v6 }
0x1215   :  { %v3371_v8 = vsel %vm58_vm0, %v3367_v4, 0.0 }
0x1218   :  { %3372 = vadd.xlane.f32.xlu0 %v3371_v8 }
0x12a1   :  { %v3370_v19 = vpop.xlane.xlu0 %3369 }
0x12a2   :  { %v3374_v20 = vmul.f32 0.03125, %v3370_v19 }
0x12a4   :  { %v3376_v21 = vadd.f32 1e-05, %v3374_v20 }
0x12a5   :  { %v3373_v22 = vpop.xlane.xlu0 %3372 }
0x12a6   :  { %4234 = vrsqrt.f32 %v3376_v21  ;;  %v3375_v23 = vmul.f32 0.03125, %v3373_v22 }
0x12a8   :  { %v3377_v24 = vadd.f32 1e-05, %v3375_v23 }
0x12aa   :  { %4236 = vrsqrt.f32 %v3377_v24 }
0x12b0   :  { %v4235_v25 = vpop.eup %4234 }
0x12b1   :  { %v3380_v26 = vmul.f32 %v4235_v25, %v3364_v59 }
0x12b3   :  { %v3386_v29 = vmul.f32 %v3710_v27, %v3380_v26 }
0x12b4   :  { %v4237_v28 = vpop.eup %4236 }
0x12b5   :  { %v3381_v47 = vmul.f32 %v4237_v28, %v3365_v5  ;;  %v3392_v34 = vadd.f32 %v3711_v30, %v3386_v29 }
0x12b7   :  { %v3387_v33 = vmul.f32 %v3710_v27, %v3381_v47 }
0x12b9   :  { %v3393_v37 = vadd.f32 %v3711_v30, %v3387_v33 }
0x12bb   :  { %v3394_v38 = vpack.c.bf16 %v3393_v37, %v3392_v34 }
0x12bd   :  { %4057 = vmatmul.mubr.msk.bf16.vlgmr.msra.gmra.mrb[52].mxu0 %vm58_vm0, %v3394_v38 }
0x12be   :  { %4084 = vmatprep.mubr.msk.bf16.mxu0 %vm4239_vm1, %v4238_v15  ;;  %4081 = vmatpush3.bf16.msra.mxu0 %v4156_v44 }
0x12bf   :  { %4082 = vmatprep.subr.bf16.mxu0 %v4238_v15 }
0x12c2   :  { %4083 = vmatpush3.bf16.msra.mxu0 %v4157_v41 }
0x1390   :  { %v3448_v0 = vpop.f32.mrb[52].mxu0 }
0x1391   :  { %v3449_v35 = vadd.f32 %v3712_v45, %v3448_v0  ;;  %v4058_v48 = vpop.f32.mrb[53].mxu0 }
0x1392   :  { %v3451_v49 = vpop.f32.mrb[54].mxu0 }
0x1393   :  { %v3452_v40 = vadd.f32 %v3712_v45, %v3451_v49  ;;  %v4059_v1 = vpop.f32.mrb[55].mxu0  ;;  %v3455_v50 = vmax.f32 %v3449_v35, 0.0 }
0x1395   :  { %v3456_v42 = vmax.f32 %v3452_v40, 0.0 }
0x1397   :  { %v3457_v36 = vpack.c.bf16 %v3456_v42, %v3455_v50 }
0x1399   :  { %4077 = vmatmul.mubr.bf16.vlgmr.msra.gmra.mrb[36].mxu1 %v3457_v36 }
0x146c   :  { %v3540_v46 = vpop.f32.mrb[36].mxu1 }
0x146d   :  { %v3547_v51 = vadd.f32 %v3540_v46, %v4840_v56  ;;  %v4078_v52 = vpop.f32.mrb[37].mxu1 }
0x146e   :  { %v3543_v54 = vpop.f32.mrb[38].mxu1 }
0x146f   :  { %v3548_v55 = vadd.f32 %v3543_v54, %v4843_v60  ;;  %v4079_v13 = vpop.f32.mrb[39].mxu1  ;;  %v3553_v14 = vadd.f32 %v3724_v53, %v3547_v51 }
0x1471   :  { %v3554_v57 = vadd.f32 %v3724_v53, %v3548_v55 }
0x1473   :  { %v3560_v15 = vpack.c.bf16 %v3554_v57, %v3553_v14 }
0x1475   :  { %4085 = vmatmul.mubr.msk.bf16.vlgmr.msra.gmra.mrb[56].mxu0 %vm58_vm0, %v3560_v15 }
0x1548   :  { %v3614_v61 = vpop.f32.mrb[56].mxu0 }
0x1549   :  { %v3615_v56 = vadd.f32 %v3725_v58, %v3614_v61  ;;  %v4086_v62 = vpop.f32.mrb[57].mxu0 }
0x154a   :  { %v3617_v63 = vpop.f32.mrb[58].mxu0 }
0x154b   :  { %3621 = vst [vmem:[%s4929_s3] sm:$0xff] %v3615_v56  ;;  %v3618_v2 = vadd.f32 %v3725_v58, %v3617_v63  ;;  %v4087_v60 = vpop.f32.mrb[59].mxu0 }
0x154d   :  { %3622 = vst [vmem:[%s4929_s3 + $0x8] sm:$0xff] %v3618_v2 }

</bundles_post_ra>
